<compile_context>
chip_gen: v7x
topology: tpu7x:2x2x1
jax: 0.10.0
libtpu: 0.0.40
codegen_flags: <defaults>
</compile_context>

<pallas_src>
import functools

import jax
import jax.numpy as jnp
from jax.experimental import pallas as pl
from jax.experimental.pallas import tpu as pltpu


# ----------------------------- sizing helpers --------------------------------

def _vmem_budget():
    """Scoped-VMEM budget in bytes, derived from the actual chip (v7x: 64 MiB/TC)."""
    phys = None
    try:
        phys = getattr(pltpu.get_tpu_info(), "vmem_capacity_bytes", None)
    except Exception:
        phys = None
    if not phys:
        phys = 64 * 1024 * 1024          # conservative fallback (v7x per-core VMEM)
    phys = int(phys)
    return max(32 * 1024 * 1024, (phys * 3) // 4)


def _pick_hw_tile(hw, c, itemsize, tile_bytes):
    """Lane-dense tile along H*W. Returns (hw_tile, n_tiles, needs_mask)."""
    max_lanes = max(128, (tile_bytes // (c * itemsize)) // 128 * 128)
    if hw <= max_lanes:
        # Single full-extent block (legal: equals the array dim) — only taken
        # for small maps, so it cannot blow VMEM.
        return hw, 1, False
    tile = max_lanes
    if hw % 128 == 0:
        # Prefer a 128-multiple divisor of hw (no tail masking) if one exists
        # that is not much smaller than the budgeted tile.
        t = tile
        while t >= 128 and hw % t != 0:
            t -= 128
        if t >= max(128, tile // 2):
            return t, hw // t, False
    return tile, pl.cdiv(hw, tile), True


# ------------------------------ Pallas kernels -------------------------------

def _make_stats_kernel(hw, hw_tile, needs_mask):
    """Per-(sample, channel) sum / sum-of-squares over H*W tiles.

    Accumulates into (1, C, 128) f32 VMEM scratch with pure elementwise adds
    (VPU); the cross-lane reduce and the lane-width-1 store happen only once,
    on the last tile.
    """
    slab_loop = (hw_tile % 128 == 0)
    k = hw_tile // 128 if slab_loop else 0

    def kernel(x_ref, sum_ref, sq_ref, acc_s, acc_q):
        t = pl.program_id(1)
        n_t = pl.num_programs(1)

        if slab_loop:
            @pl.when(t == 0)
            def _():
                acc_s[...] = jnp.zeros_like(acc_s)
                acc_q[...] = jnp.zeros_like(acc_q)

            base = t * hw_tile

            def add_slab(off_lane, base_pos):
                sl = x_ref[:, :, pl.ds(off_lane, 128)].astype(jnp.float32)
                if needs_mask:
                    lane = jax.lax.broadcasted_iota(jnp.int32, sl.shape, 2)
                    sl = jnp.where(base_pos + lane < hw, sl, 0.0)
                acc_s[...] += sl
                acc_q[...] += sl * sl

            if k <= 8:
                for j in range(k):                     # short: trace-time unroll
                    add_slab(j * 128, base + j * 128)
            else:
                def body(j, carry):
                    off = pl.multiple_of(j * 128, 128)
                    add_slab(off, base + off)
                    return carry
                jax.lax.fori_loop(0, k, body, 0)

            @pl.when(t == n_t - 1)
            def _():
                sum_ref[...] = jnp.sum(acc_s[...], axis=-1, keepdims=True)
                sq_ref[...] = jnp.sum(acc_q[...], axis=-1, keepdims=True)
        else:
            # Small full-extent tile (hw not 128-aligned, n_t == 1): direct reduce.
            xt = x_ref[...].astype(jnp.float32)
            sum_ref[...] = jnp.sum(xt, axis=-1, keepdims=True)
            sq_ref[...] = jnp.sum(xt * xt, axis=-1, keepdims=True)

    return kernel


def _norm_kernel(x_ref, scale_ref, shift_ref, o_ref):
    """y = x * scale[n, c] + shift[n, c] — one FMA per element, lane-dense tiles."""
    x = x_ref[...].astype(jnp.float32)
    o_ref[...] = (x * scale_ref[...] + shift_ref[...]).astype(o_ref.dtype)


def _fused_kernel(x_ref, w_ref, b_ref, w1_ref, w2_ref, o_ref, *, hw, eps):
    """One grid point == one domain: stats + affine + SE recalibration + write.

    x_ref: (1, bh, C, HW) whole-domain slab (fits VMEM by construction).
    Cuts HBM traffic from 3x|x| (read, read, write) to 2x|x|.
    """
    x = x_ref[...].astype(jnp.float32)                       # (1, bh, C, HW)
    bh = x.shape[1]
    m = bh * hw

    s_n = jnp.sum(x, axis=3, keepdims=True)                  # (1, bh, C, 1)
    sq_n = jnp.sum(x * x, axis=3, keepdims=True)
    s = jnp.sum(s_n, axis=1, keepdims=True)                  # (1, 1, C, 1)
    sq = jnp.sum(sq_n, axis=1, keepdims=True)
    mu = s / m
    var = jnp.maximum(sq / m - mu * mu, 0.0)                 # biased batch var
    inv = jax.lax.rsqrt(var + eps)

    g = w_ref[...][..., None].astype(jnp.float32)            # (1, 1, C, 1)
    b = b_ref[...][..., None].astype(jnp.float32)
    scale = g * inv
    shift = b - mu * scale

    # SE recalibration on the RAW input (per-sample channel weights).
    avg = s_n[..., 0] / hw                                   # (1, bh, C)
    w1 = w1_ref[...].astype(jnp.float32)                     # (1, C16, C)
    w2 = w2_ref[...].astype(jnp.float32)                     # (1, C, C16)
    # Tiny matmuls: broadcast-multiply + lane reduce (VPU), not worth the MXU.
    hid = jnp.maximum(
        jnp.sum(avg[:, :, None, :] * w1[:, None, :, :], axis=-1), 0.0)  # (1,bh,C16)
    cw = jax.nn.sigmoid(
        jnp.sum(hid[:, :, None, :] * w2[:, None, :, :], axis=-1))       # (1,bh,C)

    o_ref[...] = ((x * scale + shift) * cw[..., None]).astype(o_ref.dtype)


# --------------------------------- wrapper ------------------------------------

def domain_modal_specific_rc_batchnorm2d(
        x, step, bn_weight, bn_bias, attn_w1, attn_w2, eps=1e-9,
        *, force_two_pass=False, tile_bytes=None, donate_x=False):
    """Forward of DomainModalSpecificRcBatchNorm2d (training-mode batch stats).

    x:         (B, C, H, W)
    bn_weight: (2, C)         rows = [bns1[step].weight, bns2[step].weight]
    bn_bias:   (2, C)
    attn_w1:   (2, C//16, C)  attention1.weight (bias=False)
    attn_w2:   (2, C, C//16)  attention2.weight (bias=False)
    Returns (y, step), y in x.dtype.
    """
    B, C, H, W = x.shape
    assert B % 2 == 0, "batch must split evenly into the two domains"
    assert C >= 16, "SE bottleneck needs num_features // 16 >= 1"
    bh = B // 2
    HW = H * W
    C16 = C // 16
    itemsize = jnp.dtype(x.dtype).itemsize

    vmem_limit = _vmem_budget()
    io_aliases = {0: 0} if donate_x else {}

    # ---------------- fused single-sweep path (domain slab fits VMEM) ---------
    slab_f32 = bh * C * HW * 4
    if (not force_two_pass) and slab_f32 <= vmem_limit // 12:
        x4 = x.reshape(2, bh, C, HW)
        w3 = bn_weight.reshape(2, 1, C)
        b3 = bn_bias.reshape(2, 1, C)
        y4 = pl.pallas_call(
            functools.partial(_fused_kernel, hw=HW, eps=eps),
            out_shape=jax.ShapeDtypeStruct((2, bh, C, HW), x.dtype),
            grid=(2,),
            in_specs=[pl.BlockSpec((1, bh, C, HW), lambda d: (d, 0, 0, 0)),
                      pl.BlockSpec((1, 1, C), lambda d: (d, 0, 0)),
                      pl.BlockSpec((1, 1, C), lambda d: (d, 0, 0)),
                      pl.BlockSpec((1, C16, C), lambda d: (d, 0, 0)),
                      pl.BlockSpec((1, C, C16), lambda d: (d, 0, 0))],
            out_specs=pl.BlockSpec((1, bh, C, HW), lambda d: (d, 0, 0, 0)),
            compiler_params=pltpu.CompilerParams(
                dimension_semantics=("parallel",),
                vmem_limit_bytes=vmem_limit),
            input_output_aliases=io_aliases,
        )(x4, w3, b3, attn_w1, attn_w2)
        return y4.reshape(B, C, H, W), step

    # ---------------- two-pass streaming path ---------------------------------
    x3 = x.reshape(B, C, HW)          # contiguous reshape: free, no transpose
    tile_target = tile_bytes if tile_bytes is not None else min(
        12 << 20, max(1 << 20, (vmem_limit - (8 << 20)) // 6))
    hw_tile, n_t, needs_mask = _pick_hw_tile(HW, C, itemsize, tile_target)

    # pass 1: per-(sample, channel) sum / sum-of-squares (tiled over H*W)
    sums, sqs = pl.pallas_call(
        _make_stats_kernel(HW, hw_tile, needs_mask),
        out_shape=(jax.ShapeDtypeStruct((B, C, 1), jnp.float32),
                   jax.ShapeDtypeStruct((B, C, 1), jnp.float32)),
        grid=(B, n_t),
        in_specs=[pl.BlockSpec((1, C, hw_tile), lambda n, t: (n, 0, t))],
        out_specs=(pl.BlockSpec((1, C, 1), lambda n, t: (n, 0, 0)),
                   pl.BlockSpec((1, C, 1), lambda n, t: (n, 0, 0))),
        scratch_shapes=[pltpu.VMEM((1, C, 128), jnp.float32),
                        pltpu.VMEM((1, C, 128), jnp.float32)],
        compiler_params=pltpu.CompilerParams(
            dimension_semantics=("parallel", "arbitrary"),
            vmem_limit_bytes=vmem_limit),
    )(x3)
    sums = sums[..., 0]               # (B, C)
    sqs = sqs[..., 0]

    # tiny O(B*C) math: domain batch-stats + SE recalibration -> scale/shift
    m = bh * HW
    mu = sums.reshape(2, bh, C).sum(axis=1) / m                    # (2, C)
    ex2 = sqs.reshape(2, bh, C).sum(axis=1) / m
    var = jnp.maximum(ex2 - mu * mu, 0.0)                          # biased var
    inv = jax.lax.rsqrt(var + eps)
    bn_scale = bn_weight.astype(jnp.float32) * inv
    bn_shift = bn_bias.astype(jnp.float32) - mu * bn_scale

    avg = (sums / HW).reshape(2, bh, C)                            # avgpool of raw x
    hid = jnp.maximum(
        jnp.einsum("dnc,dkc->dnk", avg, attn_w1.astype(jnp.float32)), 0.0)
    cw = jax.nn.sigmoid(
        jnp.einsum("dnk,dck->dnc", hid, attn_w2.astype(jnp.float32)))

    # fold BN + recalibration: (x*bn_scale + bn_shift) * cw = x*scale + shift
    scale_nc = (bn_scale[:, None, :] * cw).reshape(B, C, 1)
    shift_nc = (bn_shift[:, None, :] * cw).reshape(B, C, 1)

    # pass 2: elementwise normalize + recalibrate (single FMA per element).
    # Tail tile (if any): OOB output writes are dropped by Pallas, no mask needed.
    y3 = pl.pallas_call(
        _norm_kernel,
        out_shape=jax.ShapeDtypeStruct((B, C, HW), x.dtype),
        grid=(B, n_t),
        in_specs=[pl.BlockSpec((1, C, hw_tile), lambda n, t: (n, 0, t)),
                  pl.BlockSpec((1, C, 1), lambda n, t: (n, 0, 0)),
                  pl.BlockSpec((1, C, 1), lambda n, t: (n, 0, 0))],
        out_specs=pl.BlockSpec((1, C, hw_tile), lambda n, t: (n, 0, t)),
        compiler_params=pltpu.CompilerParams(
            dimension_semantics=("parallel", "parallel"),
            vmem_limit_bytes=vmem_limit),
        input_output_aliases=io_aliases,
    )(x3, scale_nc, shift_nc)

    return y3.reshape(B, C, H, W), step


# ------------------------------ plain-JAX reference ---------------------------

def _reference(x, bn_weight, bn_bias, attn_w1, attn_w2, eps=1e-9):
    B, C, H, W = x.shape
    bh = B // 2
    outs = []
    for d in range(2):
        xd = x[d * bh:(d + 1) * bh].astype(jnp.float32)
        mu = jnp.mean(xd, axis=(0, 2, 3), keepdims=True)
        var = jnp.mean((xd - mu) ** 2, axis=(0, 2, 3), keepdims=True)
        g = bn_weight[d].reshape(1, C, 1, 1)
        b = bn_bias[d].reshape(1, C, 1, 1)
        x_bn = (xd - mu) / jnp.sqrt(var + eps) * g + b
        avg = jnp.mean(xd, axis=(2, 3))                          # (bh, C)
        hid = jnp.maximum(avg @ attn_w1[d].T, 0.0)
        cw = jax.nn.sigmoid(hid @ attn_w2[d].T)                  # (bh, C)
        outs.append(x_bn * cw[:, :, None, None])
    return jnp.concatenate(outs, axis=0)


if __name__ == "__main__":
    key = jax.random.PRNGKey(0)
    kx, kg, kb, k1, k2 = jax.random.split(key, 5)

    # C=32 keeps the SE bottleneck (C // 16 = 2) non-degenerate.
    B, C, H, W = 4, 32, 16, 16
    x = jax.random.normal(kx, (B, C, H, W), dtype=jnp.float32)
    bn_weight = 1.0 + 0.1 * jax.random.normal(kg, (2, C), dtype=jnp.float32)
    bn_bias = 0.1 * jax.random.normal(kb, (2, C), dtype=jnp.float32)
    attn_w1 = 0.5 * jax.random.normal(k1, (2, C // 16, C), dtype=jnp.float32)
    attn_w2 = 0.5 * jax.random.normal(k2, (2, C, C // 16), dtype=jnp.float32)

    def check(y, y_ref, name):
        y = jax.block_until_ready(y)
        err = float(jnp.max(jnp.abs(y - y_ref)))
        assert jnp.allclose(y, y_ref, atol=1e-4, rtol=1e-4), (
            f"{name}: mismatch vs reference, max abs diff = {err}")

    step = 0
    y_ref = _reference(x, bn_weight, bn_bias, attn_w1, attn_w2)

    # 1) fused single-sweep path (whole domain slab fits VMEM).
    y1, s1 = domain_modal_specific_rc_batchnorm2d(
        x, step, bn_weight, bn_bias, attn_w1, attn_w2)
    assert y1.shape == (B, C, H, W) and s1 == step
    check(y1, y_ref, "fused")

    # 2) two-pass path, multi-tile over 128-aligned H*W (no tail mask).
    y2, _ = domain_modal_specific_rc_batchnorm2d(
        x, step, bn_weight, bn_bias, attn_w1, attn_w2,
        force_two_pass=True, tile_bytes=C * 128 * 4)
    check(y2, y_ref, "two-pass aligned")

    # 3) two-pass path, unaligned H*W -> cdiv grid + in-kernel tail mask.
    Hm, Wm = 12, 12
    xm = jax.random.normal(kx, (B, C, Hm, Wm), dtype=jnp.float32)
    ym_ref = _reference(xm, bn_weight, bn_bias, attn_w1, attn_w2)
    y3, _ = domain_modal_specific_rc_batchnorm2d(
        xm, step, bn_weight, bn_bias, attn_w1, attn_w2,
        force_two_pass=True, tile_bytes=C * 128 * 4)
    check(y3, ym_ref, "two-pass masked tail")

    # 4) two-pass path, small unaligned map -> single full-extent block.
    y4, _ = domain_modal_specific_rc_batchnorm2d(
        xm, step, bn_weight, bn_bias, attn_w1, attn_w2, force_two_pass=True)
    check(y4, ym_ref, "two-pass full-extent")

    print("KERNEL_OK")
</pallas_src>

<mosaic_0001>
module attributes {stable_mosaic.version = 11 : i64} {
  func.func @_fused_kernel(%arg0: i32, %arg1: memref<1x2x32x256xf32, #tpu.memory_space<vmem>>, %arg2: memref<1x1x32xf32, #tpu.memory_space<vmem>>, %arg3: memref<1x1x32xf32, #tpu.memory_space<vmem>>, %arg4: memref<1x2x32xf32, #tpu.memory_space<vmem>>, %arg5: memref<1x32x2xf32, #tpu.memory_space<vmem>>, %arg6: memref<1x2x32x256xf32, #tpu.memory_space<vmem>>) attributes {dimension_semantics = [#tpu.dimension_semantics<parallel>], iteration_bounds = array<i64: 2>, scalar_prefetch = 0 : i64, scratch_operands = 0 : i64, tpu.core_type = #tpu.core_type<tc>, window_params = [{transform_indices = @transform_0, window_bounds = array<i64: 1, 2, 32, 256>}, {transform_indices = @transform_1, window_bounds = array<i64: 1, 1, 32>}, {transform_indices = @transform_2, window_bounds = array<i64: 1, 1, 32>}, {transform_indices = @transform_3, window_bounds = array<i64: 1, 2, 32>}, {transform_indices = @transform_4, window_bounds = array<i64: 1, 32, 2>}, {transform_indices = @transform_5, window_bounds = array<i64: 1, 2, 32, 256>}]} {
    %c0 = arith.constant 0 : index
    %c0_0 = arith.constant 0 : index
    %c0_1 = arith.constant 0 : index
    %c0_2 = arith.constant 0 : index
    %0 = vector.load %arg1[%c0, %c0_0, %c0_1, %c0_2] : memref<1x2x32x256xf32, #tpu.memory_space<vmem>>, vector<1x2x32x256xf32>
    %cst = arith.constant dense<0.000000e+00> : vector<1x2x32xf32>
    %1 = vector.multi_reduction <add>, %0, %cst [3] : vector<1x2x32x256xf32> to vector<1x2x32xf32>
    %2 = vector.shape_cast %1 : vector<1x2x32xf32> to vector<1x2x32x1xf32>
    %3 = arith.mulf %0, %0 : vector<1x2x32x256xf32>
    %cst_3 = arith.constant dense<0.000000e+00> : vector<1x2x32xf32>
    %4 = vector.multi_reduction <add>, %3, %cst_3 [3] : vector<1x2x32x256xf32> to vector<1x2x32xf32>
    %5 = vector.shape_cast %4 : vector<1x2x32xf32> to vector<1x2x32x1xf32>
    %cst_4 = arith.constant dense<0.000000e+00> : vector<1x32x1xf32>
    %6 = vector.multi_reduction <add>, %2, %cst_4 [1] : vector<1x2x32x1xf32> to vector<1x32x1xf32>
    %7 = vector.shape_cast %6 : vector<1x32x1xf32> to vector<1x1x32x1xf32>
    %cst_5 = arith.constant dense<0.000000e+00> : vector<1x32x1xf32>
    %8 = vector.multi_reduction <add>, %5, %cst_5 [1] : vector<1x2x32x1xf32> to vector<1x32x1xf32>
    %9 = vector.shape_cast %8 : vector<1x32x1xf32> to vector<1x1x32x1xf32>
    %cst_6 = arith.constant 5.120000e+02 : f32
    %10 = vector.broadcast %cst_6 : f32 to vector<1x1x32x1xf32>
    %11 = arith.divf %7, %10 : vector<1x1x32x1xf32>
    %cst_7 = arith.constant 5.120000e+02 : f32
    %12 = vector.broadcast %cst_7 : f32 to vector<1x1x32x1xf32>
    %13 = arith.divf %9, %12 : vector<1x1x32x1xf32>
    %14 = arith.mulf %11, %11 : vector<1x1x32x1xf32>
    %15 = arith.subf %13, %14 : vector<1x1x32x1xf32>
    %cst_8 = arith.constant 0.000000e+00 : f32
    %16 = vector.broadcast %cst_8 : f32 to vector<1x1x32x1xf32>
    %17 = arith.maximumf %15, %16 : vector<1x1x32x1xf32>
    %cst_9 = arith.constant 9.99999971E-10 : f32
    %18 = vector.broadcast %cst_9 : f32 to vector<1x1x32x1xf32>
    %19 = arith.addf %17, %18 : vector<1x1x32x1xf32>
    %20 = math.rsqrt %19 : vector<1x1x32x1xf32>
    %c0_10 = arith.constant 0 : index
    %c0_11 = arith.constant 0 : index
    %c0_12 = arith.constant 0 : index
    %21 = vector.load %arg2[%c0_10, %c0_11, %c0_12] : memref<1x1x32xf32, #tpu.memory_space<vmem>>, vector<1x1x32xf32>
    %22 = vector.shape_cast %21 : vector<1x1x32xf32> to vector<1x1x32x1xf32>
    %c0_13 = arith.constant 0 : index
    %c0_14 = arith.constant 0 : index
    %c0_15 = arith.constant 0 : index
    %23 = vector.load %arg3[%c0_13, %c0_14, %c0_15] : memref<1x1x32xf32, #tpu.memory_space<vmem>>, vector<1x1x32xf32>
    %24 = vector.shape_cast %23 : vector<1x1x32xf32> to vector<1x1x32x1xf32>
    %25 = arith.mulf %22, %20 : vector<1x1x32x1xf32>
    %26 = arith.mulf %11, %25 : vector<1x1x32x1xf32>
    %27 = arith.subf %24, %26 : vector<1x1x32x1xf32>
    %28 = vector.shape_cast %2 : vector<1x2x32x1xf32> to vector<1x2x32xf32>
    %cst_16 = arith.constant 2.560000e+02 : f32
    %29 = vector.broadcast %cst_16 : f32 to vector<1x2x32xf32>
    %30 = arith.divf %28, %29 : vector<1x2x32xf32>
    %c0_17 = arith.constant 0 : index
    %c0_18 = arith.constant 0 : index
    %c0_19 = arith.constant 0 : index
    %31 = vector.load %arg4[%c0_17, %c0_18, %c0_19] : memref<1x2x32xf32, #tpu.memory_space<vmem>>, vector<1x2x32xf32>
    %c0_20 = arith.constant 0 : index
    %c0_21 = arith.constant 0 : index
    %c0_22 = arith.constant 0 : index
    %32 = vector.load %arg5[%c0_20, %c0_21, %c0_22] : memref<1x32x2xf32, #tpu.memory_space<vmem>>, vector<1x32x2xf32>
    %33 = vector.shape_cast %30 : vector<1x2x32xf32> to vector<1x2x1x32xf32>
    %34 = vector.shape_cast %31 : vector<1x2x32xf32> to vector<1x1x2x32xf32>
    %35 = vector.broadcast %33 : vector<1x2x1x32xf32> to vector<1x2x2x32xf32>
    %36 = vector.broadcast %34 : vector<1x1x2x32xf32> to vector<1x2x2x32xf32>
    %37 = arith.mulf %35, %36 : vector<1x2x2x32xf32>
    %cst_23 = arith.constant dense<0.000000e+00> : vector<1x2x2xf32>
    %38 = vector.multi_reduction <add>, %37, %cst_23 [3] : vector<1x2x2x32xf32> to vector<1x2x2xf32>
    %cst_24 = arith.constant 0.000000e+00 : f32
    %39 = vector.broadcast %cst_24 : f32 to vector<1x2x2xf32>
    %40 = arith.maximumf %38, %39 : vector<1x2x2xf32>
    %41 = vector.shape_cast %40 : vector<1x2x2xf32> to vector<1x2x1x2xf32>
    %42 = vector.shape_cast %32 : vector<1x32x2xf32> to vector<1x1x32x2xf32>
    %43 = vector.broadcast %41 : vector<1x2x1x2xf32> to vector<1x2x32x2xf32>
    %44 = vector.broadcast %42 : vector<1x1x32x2xf32> to vector<1x2x32x2xf32>
    %45 = arith.mulf %43, %44 : vector<1x2x32x2xf32>
    %cst_25 = arith.constant dense<0.000000e+00> : vector<1x2x32xf32>
    %46 = vector.multi_reduction <add>, %45, %cst_25 [3] : vector<1x2x32x2xf32> to vector<1x2x32xf32>
    %47 = arith.negf %46 : vector<1x2x32xf32>
    %48 = math.exp %47 : vector<1x2x32xf32>
    %cst_26 = arith.constant 1.000000e+00 : f32
    %49 = vector.broadcast %cst_26 : f32 to vector<1x2x32xf32>
    %50 = arith.addf %49, %48 : vector<1x2x32xf32>
    %51 = arith.divf %49, %50 : vector<1x2x32xf32>
    %52 = vector.broadcast %25 : vector<1x1x32x1xf32> to vector<1x2x32x256xf32>
    %53 = arith.mulf %0, %52 : vector<1x2x32x256xf32>
    %54 = vector.broadcast %27 : vector<1x1x32x1xf32> to vector<1x2x32x256xf32>
    %55 = arith.addf %53, %54 : vector<1x2x32x256xf32>
    %56 = vector.shape_cast %51 : vector<1x2x32xf32> to vector<1x2x32x1xf32>
    %57 = vector.broadcast %56 : vector<1x2x32x1xf32> to vector<1x2x32x256xf32>
    %58 = arith.mulf %55, %57 : vector<1x2x32x256xf32>
    %c0_27 = arith.constant 0 : index
    %c0_28 = arith.constant 0 : index
    %c0_29 = arith.constant 0 : index
    %c0_30 = arith.constant 0 : index
    %59 = vector.load %arg6[%c0_27, %c0_28, %c0_29, %c0_30] : memref<1x2x32x256xf32, #tpu.memory_space<vmem>>, vector<1x2x32x256xf32>
    tpu.vector_store %arg6[%c0_27, %c0_28, %c0_29, %c0_30], %58 {strides = array<i32>} : memref<1x2x32x256xf32, #tpu.memory_space<vmem>>, vector<1x2x32x256xf32>,
    return
  }
  func.func @transform_0(%arg0: i32) -> (i32, i32, i32, i32) {
    %c0_i32 = arith.constant 0 : i32
    %c0_i32_0 = arith.constant 0 : i32
    %c0_i32_1 = arith.constant 0 : i32
    %c0_i32_2 = arith.constant 0 : i32
    return %arg0, %c0_i32, %c0_i32_0, %c0_i32_1 : i32, i32, i32, i32
  }
  func.func @transform_1(%arg0: i32) -> (i32, i32, i32) {
    %c0_i32 = arith.constant 0 : i32
    %c0_i32_0 = arith.constant 0 : i32
    %c0_i32_1 = arith.constant 0 : i32
    return %arg0, %c0_i32, %c0_i32_0 : i32, i32, i32
  }
  func.func @transform_2(%arg0: i32) -> (i32, i32, i32) {
    %c0_i32 = arith.constant 0 : i32
    %c0_i32_0 = arith.constant 0 : i32
    %c0_i32_1 = arith.constant 0 : i32
    return %arg0, %c0_i32, %c0_i32_0 : i32, i32, i32
  }
  func.func @transform_3(%arg0: i32) -> (i32, i32, i32) {
    %c0_i32 = arith.constant 0 : i32
    %c0_i32_0 = arith.constant 0 : i32
    %c0_i32_1 = arith.constant 0 : i32
    return %arg0, %c0_i32, %c0_i32_0 : i32, i32, i32
  }
  func.func @transform_4(%arg0: i32) -> (i32, i32, i32) {
    %c0_i32 = arith.constant 0 : i32
    %c0_i32_0 = arith.constant 0 : i32
    %c0_i32_1 = arith.constant 0 : i32
    return %arg0, %c0_i32, %c0_i32_0 : i32, i32, i32
  }
  func.func @transform_5(%arg0: i32) -> (i32, i32, i32, i32) {
    %c0_i32 = arith.constant 0 : i32
    %c0_i32_0 = arith.constant 0 : i32
    %c0_i32_1 = arith.constant 0 : i32
    %c0_i32_2 = arith.constant 0 : i32
    return %arg0, %c0_i32, %c0_i32_0, %c0_i32_1 : i32, i32, i32, i32
  }
}

</mosaic_0001>

<bundles_post_ra>
// kernel: tpu_custom_call.1
= control target key start
LH: loop header
LB: loop body
LE: loop exit
PB: predicated region body
PF: predicated region fallthrough
CT: control target
= control target key end

     0   :  { %10 = vsyncpa [#allocation3], 0  ;;  %s2979_s0 = inlined_call_operand.hbm [shape: f32[2,2,32,256], index: 0, kind: input, shape index: {}]   ;;  %s2980_s1 = inlined_call_operand.vmem [shape: f32[2,1,32], index: 1, kind: input, shape index: {}]   ;;  %s2981_s2 = inlined_call_operand.vmem [shape: f32[2,1,32], index: 2, kind: input, shape index: {}]   ;;  %s2982_s3 = inlined_call_operand.vmem [shape: f32[2,2,32], index: 3, kind: input, shape index: {}]   ;;  %s2983_s4 = inlined_call_operand.vmem [shape: f32[2,32,2], index: 4, kind: input, shape index: {}]   ;;  %s2984_s5 = inlined_call_operand.hbm [shape: f32[2,2,32,256], index: 5, kind: output, shape index: {}]  }
   0x1   :  { %12 = vsyncpa [#allocation3 + $0x1], 0 }
   0x2   :  { %13 = vsyncpa [#allocation4], 0 }
   0x3   :  { %15 = vsyncpa [#allocation4 + $0x1], 0  ;;  %s2156_s18 = smov 0   ;;  %s2158_s19 = smov 0  }
   0x4   :  { %s2160_s20 = smov 0   ;;  %s2162_s21 = smov 0  }
   0x5 LB: > { %s2177_s22 = sadd.s32 4294967295, %s2117_s21   ;;  %s1888_s23 = sadd.s32 4294967294, %s2117_s21   ;;  %s2117_s21 = sphi %s2162_s21, %s2997_s21   ;;  %s2113_s20 = sphi %s2160_s20, %s2996_s20   ;;  %s2109_s19 = sphi %s2158_s19, %s2995_s19   ;;  %s2105_s18 = sphi %s2156_s18, %s2994_s18  }
   0x6   : > { %s2181_s24 = sadd.s32 1, %s2117_s21   ;;  %s28_s25 = sadd.s32 1, %s2113_s20 }
   0x7   : > { %s25_s26 = ssub.s32 %s2117_s21, %s2181_s24  ;;  %p35_p0 = scmp.ne.s32.totalorder %s2113_s20, %s2109_s19 }
   0x8   : > { %p26_p1 = scmp.eq.s32.totalorder %s25_s26, 0  ;;  %p36_p2 = scmp.eq.s32.totalorder %s2117_s21, 0 }
   0x9   : > { %p41_p3 = scmp.ne.s32.totalorder %s2109_s19, %s2105_s18  ;;  %p42_p4 = scmp.eq.s32.totalorder %s2177_s22, 0 }
   0xa   : > { %s2193_s27 = scalar_select %p26_p1, %s2113_s20, %s28_s25  }
   0xb   : > { %p2195_p5 = por %p36_p2, %p35_p0  ;;  %p2199_p6 = por %p42_p4, %p41_p3 }
   0xc   : > { %p169_p7 = scmp.eq.s32.totalorder %s2177_s22, 1  ;;  %p175_p8 = scmp.eq.s32.totalorder %s1888_s23, 1 }
   0xd   : > { %p1930_p10 = scmp.lt.s32.totalorder %s2117_s21, 2  ;;  %s195_s7 = sand.u32 1, %s2113_s20  }
   0xe   : > { %p2206_p11 = por %p169_p7, %p35_p0  ;;  %p2210_p12 = por %p175_p8, %p41_p3 }
   0xf   : > { %s1915_s8 = sshll.u32 %s2117_s21, 11  ;;  %s1891_s9 = sshll.u32 %s195_s7, 7 }
  0x10   : > { %s2988_s30 = scalar_select %p2206_p11, 1, 0 }
  0x11   : > { %s2989_s6 = scalar_select %p2210_p12, 1, 0 }
  0x12   : > { %s2219_s12 = scalar_lea.hbm %s2979_s0, %s1915_s8  ;;  %s199_s13 = scalar_lea.vmem [#allocation2], %s1891_s9 }
  0x13   : > { %s206_s14 = sshll.u32 %s199_s13, 4  ;;  %p2223_p13 = pnand %p1930_p10, %p2195_p5  ;;  %s2227_s14 = int_to_ptr.vmem [resolvable:$true] %s206_s14 }
  0x14   : > { %s2229_s16 = scalar_lea.sflag [#allocation3], %s195_s7  ;;  %s2021_s17 = scalar_lea.hbm %s2219_s12, 2048 }
  0x15   : > { %p2022_p0 = scmp.ne.s32.totalorder %s2219_s12, %s2021_s17  ;;  %p2023_p1 = pneg %p2223_p13 }
  0x16   : > { %s2026_s26 = scalar_lea.hbm %s2979_s0, 4096  ;;  %p2027_p4 = scmp.lt.u32.totalorder %s2219_s12, %s2979_s0 }
  0x17   : > { %p2024_p2 = pnand %p2023_p1, %p2022_p0  ;;  %p2028_p5 = scmp.lt.u32.totalorder %s2026_s26, %s2021_s17 }
  0x18   : > { %p2030_p8 = scmp.lt.u32.totalorder %s2021_s17, %s2219_s12 }
  0x19   : > { %p2025_p3 = pneg %p2024_p2  ;;  %p2029_p7 = por %p2028_p5, %p2027_p4 }
  0x1b   : > { %p2031_p10 = por %p2030_p8, %p2029_p7 }
  0x1d   : > { %p2032_p9 = pnand %p2031_p10, %p2025_p3 }
  0x1f   : > { %2035 = shalt.err (!%p2032_p9)
}
  0x20   : > { %s2036_s7 = scalar_lea.vmem %s2227_s14, 2048  ;;  %s2119_s9 = smov [#allocation2]  }
  0x21   : > { %p2037_p0 = scmp.ne.s32.totalorder %s2227_s14, %s2036_s7  ;;  %s2041_s10 = sshll.u32 %s2119_s9, 4  ;;  %s2042_s10 = int_to_ptr.vmem [resolvable:$false] %s2041_s10 }
  0x22   : > { %s2043_s11 = scalar_lea.vmem %s2042_s10, 4096  ;;  %p2044_p11 = scmp.lt.s32.totalorder %s2227_s14, %s2042_s10 }
  0x23   : > { %p2039_p2 = pnand %p2037_p0, %p2023_p1  ;;  %p2045_p4 = scmp.lt.s32.totalorder %s2043_s11, %s2036_s7 }
  0x25   : > { %p2040_p12 = pneg %p2039_p2  ;;  %p2046_p5 = por %p2045_p4, %p2044_p11 }
  0x27   : > { %p2047_p7 = pnand %p2046_p5, %p2040_p12 }
  0x29   : > { %2050 = shalt.err (!%p2047_p7)
}
  0x2a   : > { %s2120_s13 = smov 256   ;;  %s2121_s17 = smov 16  }
  0x2b   : > { %1925 = dma.hbm_to_vmem [thread:$0]  (!%p2223_p13), %s2219_s12, 2048, %s2227_s14, %s2229_s16, %s2120_s13, %s2120_s13, %s2121_s17  }
  0x2c   : > { %p1894_p9 = scmp.ge.s32.totalorder %s2117_s21, 1  ;;  %p241_p1 = scmp.lt.s32.totalorder %s2117_s21, 3 }
  0x2e   : > { %p242_p3 = pnand %p1894_p9, %p241_p1 }
  0x2f   : > { %s2260_s23 = sand.u32 (!%p242_p3), 1, %s2109_s19  }
  0x30   : > { %245 = sbr.rel (%p242_p3) target bundleno = 990 (0x3de), region = 40  ;;  %s1895_s25 = sshll.u32 (!%p242_p3), %s2260_s23, 7 }
  0x31   : > { %s248_s26 = scalar_lea.sflag (!%p242_p3), [#allocation3], %s2260_s23  ;;  %s2266_s28 = scalar_lea.vmem (!%p242_p3), [#allocation2], %s1895_s25 }
  0x37   : > { %2096 = dma.done.wait (%p2199_p6), %s248_s26, 2048  }
  0x38   : > { %2098 = vsyncadd (%p2199_p6), %s248_s26, 4294965248  ;;  %v312_v0 = vld [vmem:[%s2266_s28 + $0x20] sm:$0xff]  ;;  %v313_v1 = vld [vmem:[%s2266_s28 + $0x28] sm:$0xff]  ;;  %p293_p6 = scmp.lt.s32.totalorder %s2177_s22, 1  ;;  %v492_v49 = vlaneseq  ;;  %v2122_v55 = vmov 0   ;;  %vm629_vm0 = vcmask 130112  }
  0x39   : > { %v308_v2 = vld [vmem:[%s2266_s28] sm:$0xff]  ;;  %v330_v3 = vadd.f32 %v313_v1, %v312_v0  ;;  %v309_v4 = vld [vmem:[%s2266_s28 + $0x8] sm:$0xff]  ;;  %v314_v5 = vld [vmem:[%s2266_s28 + $0x30] sm:$0xff]  ;;  %v352_v32 = vmul.f32 %v312_v0, %v312_v0  ;;  %v353_v33 = vmul.f32 %v313_v1, %v313_v1  ;;  %1969 = vset.pattern.permute.xlu0 %v2122_v55  ;;  %1970 = vset.pattern.permute.xlu1 %v2122_v55  ;;  %vm636_vm1 = vcmask 195712   ;;  %s1760_s8 = scalar_lea.sflag [#allocation4], %s2260_s23  ;;  %p2991_p12 = scmp.ne.s32.totalorder %s2988_s30, 0 }
  0x3a   : > { %v315_v6 = vld [vmem:[%s2266_s28 + $0x38] sm:$0xff]  ;;  %v324_v7 = vadd.f32 %v309_v4, %v308_v2  ;;  %v310_v8 = vld [vmem:[%s2266_s28 + $0x10] sm:$0xff]  ;;  %v2287_v14 = vld [vmem:[%s2266_s28 + $0x40] sm:$0xff]  ;;  %v348_v26 = vmul.f32 %v308_v2, %v308_v2  ;;  %v349_v27 = vmul.f32 %v309_v4, %v309_v4  ;;  %v354_v29 = vmul.f32 %v314_v5, %v314_v5  ;;  %s2320_s29 = scalar_select %p293_p6, %s2177_s22, 1 }
  0x3b   : > { %v311_v9 = vld [vmem:[%s2266_s28 + $0x18] sm:$0xff]  ;;  %331 = vadd.xlane.f32.xlu1 %v330_v3  ;;  %v333_v10 = vadd.f32 %v315_v6, %v314_v5  ;;  %v2281_v12 = vld [vmem:[%s2266_s28 + $0x50] sm:$0xff]  ;;  %v2290_v15 = vld [vmem:[%s2266_s28 + $0x48] sm:$0xff]  ;;  %v350_v23 = vmul.f32 %v310_v8, %v310_v8  ;;  %v355_v30 = vmul.f32 %v315_v6, %v315_v6  ;;  %v370_v37 = vadd.f32 %v353_v33, %v352_v32 }
  0x3c   : > { %325 = vadd.xlane.f32.xlu0 %v324_v7  ;;  %v327_v11 = vadd.f32 %v311_v9, %v310_v8  ;;  %v2284_v13 = vld [vmem:[%s2266_s28 + $0x58] sm:$0xff]  ;;  %v336_v17 = vadd.f32 %v2290_v15, %v2287_v14  ;;  %v322_v18 = vld [vmem:[%s2266_s28 + $0x70] sm:$0xff]  ;;  %v2299_v20 = vld [vmem:[%s2266_s28 + $0x60] sm:$0xff]  ;;  %v351_v24 = vmul.f32 %v311_v9, %v311_v9  ;;  %v364_v31 = vadd.f32 %v349_v27, %v348_v26  ;;  %s295_s15 = scalar_lea.vmem %s2980_s1, %s2320_s29  ;;  %s298_s7 = scalar_lea.vmem %s2981_s2, %s2320_s29 }
  0x3d   : > { %v339_v16 = vadd.f32 %v2284_v13, %v2281_v12  ;;  %v323_v19 = vld [vmem:[%s2266_s28 + $0x78] sm:$0xff]  ;;  %v2302_v21 = vld [vmem:[%s2266_s28 + $0x68] sm:$0xff]  ;;  %v373_v34 = vadd.f32 %v355_v30, %v354_v29  ;;  %v358_v35 = vmul.f32 %v2281_v12, %v2281_v12  ;;  %v359_v36 = vmul.f32 %v2284_v13, %v2284_v13  ;;  %v1900_v48 = vld [vmem:[%s295_s15] ss:$0 sm:$0xff]  ;;  %s1897_s9 = sshll.u32 %s2320_s29, 1  ;;  %s1916_s17 = sshll.u32 %s2320_s29, 5 }
  0x3e   : > { %v345_v22 = vadd.f32 %v323_v19, %v322_v18  ;;  %v342_v25 = vadd.f32 %v2302_v21, %v2299_v20  ;;  %v367_v28 = vadd.f32 %v351_v24, %v350_v23  ;;  %v356_v38 = vmul.f32 %v2287_v14, %v2287_v14  ;;  %v1901_v51 = vld [vmem:[%s298_s7] ss:$0 sm:$0xff]  ;;  %s302_s13 = scalar_lea.vmem %s2982_s3, %s1897_s9  ;;  %s2349_s14 = scalar_lea.vmem %s2983_s4, %s1916_s17 }
  0x3f   : > { %334 = vadd.xlane.f32.xlu1 %v333_v10  ;;  %v357_v39 = vmul.f32 %v2290_v15, %v2290_v15  ;;  %v379_v40 = vadd.f32 %v359_v36, %v358_v35  ;;  %v362_v41 = vmul.f32 %v322_v18, %v322_v18  ;;  %v363_v42 = vmul.f32 %v323_v19, %v323_v19  ;;  %v486_v53 = vld [vmem:[%s302_s13] sm:$0x3]  ;;  %v2378_v8 = vld [vmem:[%s2349_s14 + $0x8] sm:$0xff]  ;;  %s2888_s29 = scalar_lea.vmem [#allocation5], %s1895_s25  ;;  %s1917_s25 = sshll.u32 %s2177_s22, 11 }
  0x40   : > { %328 = vadd.xlane.f32.xlu0 %v327_v11  ;;  %v360_v44 = vmul.f32 %v2299_v20, %v2299_v20  ;;  %v361_v45 = vmul.f32 %v2302_v21, %v2302_v21  ;;  %v2332_v50 = vshrl.u32 %v492_v49, 7  ;;  %v487_v58 = vld [vmem:[%s2349_s14] sm:$0xff]  ;;  %vm643_vm2 = vcmask 261312   ;;  %s1773_s15 = sshll.u32 %s2888_s29, 4  ;;  %s2929_s16 = scalar_lea.hbm %s2984_s5, %s1917_s25  ;;  %s2931_s15 = int_to_ptr.vmem [resolvable:$true] %s1773_s15 }
  0x41   : > { %v376_v43 = vadd.f32 %v357_v39, %v356_v38  ;;  %v385_v46 = vadd.f32 %v363_v42, %v362_v41  ;;  %vm702_vm3 = vcmask 1041409   ;;  %vm707_vm4 = vcmask 254976   ;;  %s2051_s7 = scalar_lea.vmem %s2931_s15, 2048  ;;  %s2123_s9 = smov [#allocation5]  }
  0x42   : > { %v382_v47 = vadd.f32 %v361_v45, %v360_v44  ;;  %v2338_v52 = vsub.s32 0, %v2332_v50  ;;  %v2342_v56 = vsub.s32 1, %v2332_v50  ;;  %v2354_v60 = vsub.s32 3, %v2332_v50  ;;  %p2052_p11 = scmp.ne.s32.totalorder %s2931_s15, %s2051_s7  ;;  %s2055_s10 = sshll.u32 %s2123_s9, 4  ;;  %s2056_s10 = int_to_ptr.vmem [resolvable:$false] %s2055_s10 }
  0x43   : > { %340 = vadd.xlane.f32.xlu1 %v339_v16  ;;  %v2358_v62 = vsub.s32 2, %v2332_v50  ;;  %v2362_v0 = vsub.s32 5, %v2332_v50  ;;  %v2366_v2 = vsub.s32 4, %v2332_v50  ;;  %v2370_v4 = vsub.s32 7, %v2332_v50  ;;  %s2057_s11 = scalar_lea.vmem %s2056_s10, 4096  ;;  %p2058_p10 = scmp.lt.s32.totalorder %s2931_s15, %s2056_s10 }
  0x44   : > { %337 = vadd.xlane.f32.xlu0 %v336_v17  ;;  %v495_v54 = vrot.slane %v486_v53, %v2338_v52  ;;  %v514_v57 = vrot.slane %v486_v53, %v2342_v56  ;;  %v723_v59 = vrot.slane %v487_v58, %v2338_v52  ;;  %v730_v61 = vrot.slane %v487_v58, %v2342_v56  ;;  %p2053_p13 = pnand %p2052_p11, %p2991_p12  ;;  %p2059_p0 = scmp.lt.s32.totalorder %s2057_s11, %s2051_s7 }
  0x45   : > { %v744_v63 = vrot.slane %v487_v58, %v2354_v60  ;;  %v737_v1 = vrot.slane %v487_v58, %v2358_v62  ;;  %v758_v3 = vrot.slane %v487_v58, %v2362_v0  ;;  %v751_v5 = vrot.slane %v487_v58, %v2366_v2 }
  0x46   : > { %v2374_v6 = vsub.s32 6, %v2332_v50  ;;  %v772_v7 = vrot.slane %v487_v58, %v2370_v4  ;;  %v786_v10 = vrot.slane %v2378_v8, %v2342_v56  ;;  %v779_v11 = vrot.slane %v2378_v8, %v2338_v52  ;;  %p2054_p8 = pneg %p2053_p13  ;;  %p2060_p2 = por %p2059_p0, %p2058_p10 }
  0x47   : > { %346 = vadd.xlane.f32.xlu1 %v345_v22  ;;  %v800_v16 = vrot.slane %v2378_v8, %v2354_v60  ;;  %v793_v17 = vrot.slane %v2378_v8, %v2358_v62  ;;  %v814_v18 = vrot.slane %v2378_v8, %v2362_v0  ;;  %v807_v19 = vrot.slane %v2378_v8, %v2366_v2 }
  0x48   : > { %343 = vadd.xlane.f32.xlu0 %v342_v25  ;;  %v765_v9 = vrot.slane %v487_v58, %v2374_v6  ;;  %v821_v22 = vrot.slane %v2378_v8, %v2374_v6  ;;  %vm1553_vm5 = vcmask 1042434   ;;  %vm1555_vm6 = vcmask 1043459   ;;  %p2061_p4 = pnand %p2060_p2, %p2054_p8 }
  0x49   : > { %vm1557_vm7 = vcmask 1044484   ;;  %vm1559_vm8 = vcmask 1045509   ;;  %vm1561_vm9 = vcmask 1046534   ;;  %vm1563_vm10 = vcmask 1047559  }
  0x4a   : > { %vm1622_vm11 = vcmask 15360  }
  0x4b   : > { %368 = vadd.xlane.f32.xlu1 %v367_v28 }
  0x4c   : > { %365 = vadd.xlane.f32.xlu0 %v364_v31 }
  0x4f   : > { %374 = vadd.xlane.f32.xlu1 %v373_v34 }
  0x50   : > { %371 = vadd.xlane.f32.xlu0 %v370_v37 }
  0x53   : > { %380 = vadd.xlane.f32.xlu1 %v379_v40 }
  0x54   : > { %377 = vadd.xlane.f32.xlu0 %v376_v43 }
  0x57   : > { %386 = vadd.xlane.f32.xlu1 %v385_v46 }
  0x58   : > { %383 = vadd.xlane.f32.xlu0 %v382_v47 }
  0x68   : > { %435 = vbcast.lane.b32.xlu1 %v1900_v48, 264 }
  0x6c   : > { %439 = vbcast.lane.b32.xlu1 %v1900_v48, 272 }
  0x6e   : > { %431 = vbcast.lane.b32.xlu0 %v1900_v48, 256 }
  0x70   : > { %443 = vbcast.lane.b32.xlu1 %v1900_v48, 280 }
  0x72   : > { %451 = vbcast.lane.b32.xlu0 %v1901_v51, 256 }
  0x74   : > { %455 = vbcast.lane.b32.xlu1 %v1901_v51, 264 }
  0x76   : > { %459 = vbcast.lane.b32.xlu0 %v1901_v51, 272 }
  0x78   : > { %463 = vbcast.lane.b32.xlu1 %v1901_v51, 280 }
  0x7a   : > { %497 = vbcast.lane.b32.xlu0 %v495_v54, 256 }
  0x7c   : > { %501 = vbcast.lane.b32.xlu1 %v495_v54, 264 }
  0x7e   : > { %505 = vbcast.lane.b32.xlu0 %v495_v54, 272 }
  0x80   : > { %509 = vbcast.lane.b32.xlu1 %v495_v54, 280 }
  0x82   : > { %516 = vbcast.lane.b32.xlu0 %v514_v57, 256 }
  0x84   : > { %520 = vbcast.lane.b32.xlu1 %v514_v57, 264 }
  0x86   : > { %524 = vbcast.lane.b32.xlu0 %v514_v57, 272 }
  0x88   : > { %528 = vbcast.lane.b32.xlu1 %v514_v57, 280 }
  0x8a   : > { %725 = vbcast.lane.b32.xlu0 %v723_v59, 256 }
  0x8c   : > { %732 = vbcast.lane.b32.xlu1 %v730_v61, 256 }
  0x8e   : > { %746 = vbcast.lane.b32.xlu0 %v744_v63, 256 }
  0x90   : > { %739 = vbcast.lane.b32.xlu1 %v737_v1, 256 }
  0x92   : > { %760 = vbcast.lane.b32.xlu0 %v758_v3, 256 }
  0x94   : > { %753 = vbcast.lane.b32.xlu1 %v751_v5, 256 }
  0x96   : > { %774 = vbcast.lane.b32.xlu0 %v772_v7, 256 }
  0x98   : > { %767 = vbcast.lane.b32.xlu1 %v765_v9, 256 }
  0x9a   : > { %788 = vbcast.lane.b32.xlu0 %v786_v10, 256 }
  0x9c   : > { %781 = vbcast.lane.b32.xlu1 %v779_v11, 256 }
  0x9e   : > { %802 = vbcast.lane.b32.xlu0 %v800_v16, 256 }
  0xa0   : > { %795 = vbcast.lane.b32.xlu1 %v793_v17, 256 }
  0xa2   : > { %816 = vbcast.lane.b32.xlu0 %v814_v18, 256 }
  0xa4   : > { %809 = vbcast.lane.b32.xlu1 %v807_v19, 256 }
  0xa8   : > { %823 = vbcast.lane.b32.xlu1 %v821_v22, 256 }
  0xc8   : > { %v2395_v23 = vpop.xlane.xlu1 %331 }
  0xc9   : > { %v326_v24 = vpop.xlane.xlu0 %325 }
  0xca   : > { %v478_v22 = vmul.f32 0.00390625, %v326_v24 }
  0xcc   : > { %v2397_v25 = vpop.xlane.xlu1 %334 }
  0xcd   : > { %v2399_v26 = vpop.xlane.xlu0 %328 }
  0xd0   : > { %v2401_v27 = vpop.xlane.xlu1 %340 }
  0xd1   : > { %v2403_v28 = vpop.xlane.xlu0 %337  ;;  %v389_v33 = vadd.f32 %v2401_v27, %v2399_v26 }
  0xd2   : > { %v388_v34 = vadd.f32 %v2403_v28, %v326_v24 }
  0xd3   : > { %v398_v37 = vmul.f32 0.001953125, %v389_v33 }
  0xd4   : > { %v2405_v29 = vpop.xlane.xlu1 %346  ;;  %v397_v38 = vmul.f32 0.001953125, %v388_v34 }
  0xd5   : > { %v2407_v30 = vpop.xlane.xlu0 %343  ;;  %v406_v44 = vmul.f32 %v398_v37, %v398_v37 }
  0xd6   : > { %v390_v39 = vadd.f32 %v2407_v30, %v2395_v23  ;;  %v405_v46 = vmul.f32 %v397_v38, %v397_v38 }
  0xd8   : > { %v369_v31 = vpop.xlane.xlu1 %368  ;;  %v399_v47 = vmul.f32 0.001953125, %v390_v39 }
  0xd9   : > { %v366_v32 = vpop.xlane.xlu0 %365 }
  0xda   : > { %v407_v59 = vmul.f32 %v399_v47, %v399_v47 }
  0xdc   : > { %v2412_v35 = vpop.xlane.xlu1 %374 }
  0xdd   : > { %v372_v36 = vpop.xlane.xlu0 %371 }
  0xe0   : > { %v381_v40 = vpop.xlane.xlu1 %380 }
  0xe1   : > { %v393_v41 = vadd.f32 %v381_v40, %v369_v31  ;;  %v378_v42 = vpop.xlane.xlu0 %377 }
  0xe2   : > { %v392_v43 = vadd.f32 %v378_v42, %v366_v32 }
  0xe3   : > { %v402_v45 = vmul.f32 0.001953125, %v393_v41 }
  0xe4   : > { %v401_v48 = vmul.f32 0.001953125, %v392_v43  ;;  %v2416_v51 = vpop.xlane.xlu1 %386 }
  0xe5   : > { %v410_v53 = vsub.f32 %v402_v45, %v406_v44  ;;  %v384_v54 = vpop.xlane.xlu0 %383 }
  0xe6   : > { %v409_v55 = vsub.f32 %v401_v48, %v405_v46  ;;  %v394_v57 = vadd.f32 %v384_v54, %v372_v36 }
  0xe7   : > { %v414_v58 = vmax.f32 %v410_v53, 0.0 }
  0xe8   : > { %v413_v61 = vmax.f32 %v409_v55, 0.0  ;;  %v403_v63 = vmul.f32 0.001953125, %v394_v57  ;;  %v436_v1 = vpop.permute.xlu1 %435 }
  0xe9   : > { %v418_v3 = vadd.f32 1e-09, %v414_v58  ;;  %v432_v5 = vpop.permute.xlu0 %431 }
  0xea   : > { %v417_v7 = vadd.f32 1e-09, %v413_v61  ;;  %v411_v9 = vsub.f32 %v403_v63, %v407_v59 }
  0xeb   : > { %1971 = vrsqrt.f32 %v418_v3 }
  0xec   : > { %1973 = vrsqrt.f32 %v417_v7  ;;  %v415_v10 = vmax.f32 %v411_v9, 0.0  ;;  %v440_v11 = vpop.permute.xlu1 %439  ;;  %v481_v7 = vmul.f32 0.00390625, %v2397_v25 }
  0xed   : > { %v452_v16 = vpop.permute.xlu0 %451 }
  0xee   : > { %v419_v17 = vadd.f32 1e-09, %v415_v10 }
  0xf0   : > { %1975 = vrsqrt.f32 %v419_v17  ;;  %v2418_v18 = vpop.permute.xlu1 %443 }
  0xf1   : > { %v460_v19 = vpop.permute.xlu0 %459 }
  0xf4   : > { %v456_v31 = vpop.permute.xlu1 %455 }
  0xf5   : > { %v1972_v32 = vpop.eup %1971  ;;  %v498_v33 = vpop.permute.xlu0 %497 }
  0xf6   : > { %v1974_v34 = vpop.eup %1973  ;;  %v2420_v36 = vmul.f32 %v1972_v32, %v436_v1  ;;  %v538_v39 = vmul.f32 %v498_v33, %v478_v22  ;;  %v483_v32 = vmul.f32 0.00390625, %v2401_v27  ;;  %v489_v27 = vld [vmem:[%s2349_s14 + $0x10] sm:$0xff] }
  0xf7   : > { %v2422_v40 = vmul.f32 %v1974_v34, %v432_v5  ;;  %v480_v5 = vmul.f32 0.00390625, %v2395_v23  ;;  %v482_v34 = vmul.f32 0.00390625, %v2403_v28 }
  0xf8   : > { %v470_v41 = vmul.f32 %v2420_v36, %v398_v37  ;;  %571 = vperm.xlu0 %1969, %v538_v39   ;;  %v2425_v42 = vpop.permute.xlu1 %463  ;;  %v1705_v24 = vmul.f32 %v2420_v36, %v2281_v12  ;;  %v1706_v46 = vmul.f32 %v2420_v36, %v2284_v13 }
  0xf9   : > { %v469_v43 = vmul.f32 %v2422_v40, %v397_v38  ;;  %v1703_v53 = vmul.f32 %v2422_v40, %v2287_v14  ;;  %v1704_v37 = vmul.f32 %v2422_v40, %v2290_v15  ;;  %v506_v58 = vpop.permute.xlu0 %505  ;;  %v479_v14 = vmul.f32 0.00390625, %v2399_v26 }
  0xfa   : > { %v1976_v44 = vpop.eup %1975  ;;  %v2428_v45 = vsub.f32 %v456_v31, %v470_v41  ;;  %v546_v39 = vmul.f32 %v498_v33, %v482_v34  ;;  %v835_v33 = vrot.slane %v489_v27, %v2338_v52 }
  0xfb   : > { %v2434_v48 = vmul.f32 %v1976_v44, %v440_v11  ;;  %v2440_v54 = vsub.f32 %v452_v16, %v469_v43  ;;  %v485_v43 = vmul.f32 0.00390625, %v2405_v29  ;;  %v484_v44 = vmul.f32 0.00390625, %v2407_v30 }
  0xfc   : > { %v2443_v38 = vadd.f32 %v1705_v24, %v2428_v45  ;;  %v2446_v55 = vadd.f32 %v1706_v46, %v2428_v45  ;;  %v502_v12 = vpop.permute.xlu1 %501  ;;  %v828_v30 = vrot.slane %v2378_v8, %v2370_v4 }
  0xfd   : > { %v2449_v57 = vadd.f32 %v1703_v53, %v2440_v54  ;;  %v2452_v13 = vadd.f32 %v1704_v37, %v2440_v54  ;;  %v471_v15 = vmul.f32 %v2434_v48, %v399_v47  ;;  %v1707_v59 = vmul.f32 %v2434_v48, %v2299_v20  ;;  %v517_v47 = vpop.permute.xlu0 %516 }
  0xfe   : > { %v1708_v61 = vmul.f32 %v2434_v48, %v2302_v21  ;;  %v539_v1 = vmul.f32 %v502_v12, %v479_v14  ;;  %v540_v20 = vmul.f32 %v506_v58, %v480_v5  ;;  %v542_v16 = vmul.f32 %v517_v47, %v478_v22 }
  0xff   : > { %v2460_v63 = vsub.f32 %v460_v19, %v471_v15  ;;  %v547_v41 = vmul.f32 %v502_v12, %v483_v32  ;;  %v548_v22 = vmul.f32 %v506_v58, %v484_v44  ;;  %v550_v46 = vmul.f32 %v517_v47, %v482_v34 }
 0x100   : > { %v510_v3 = vpop.permute.xlu1 %509  ;;  %574 = vperm.xlu1 %1970, %v539_v1   ;;  %v849_v12 = vrot.slane %v489_v27, %v2358_v62  ;;  %v842_v58 = vrot.slane %v489_v27, %v2342_v56  ;;  %v856_v15 = vrot.slane %v489_v27, %v2354_v60  ;;  %v490_v1 = vld [vmem:[%s2349_s14 + $0x18] sm:$0xff] }
 0x101   : > { %v2465_v9 = vadd.f32 %v1707_v59, %v2460_v63  ;;  %v2468_v26 = vadd.f32 %v1708_v61, %v2460_v63  ;;  %v541_v10 = vmul.f32 %v510_v3, %v481_v7  ;;  %v525_v19 = vpop.permute.xlu0 %524  ;;  %v549_v24 = vmul.f32 %v510_v3, %v485_v43 }
 0x102   : > { %v544_v31 = vmul.f32 %v525_v19, %v480_v5  ;;  %v552_v28 = vmul.f32 %v525_v19, %v484_v44  ;;  %v877_v59 = vrot.slane %v489_v27, %v2374_v6  ;;  %v870_v61 = vrot.slane %v489_v27, %v2362_v0 }
 0x103   : > { %580 = vperm.xlu0 %1969, %v541_v10   ;;  %v891_v8 = vrot.slane %v490_v1, %v2338_v52  ;;  %v884_v3 = vrot.slane %v489_v27, %v2370_v4  ;;  %v905_v5 = vrot.slane %v490_v1, %v2358_v62  ;;  %v919_v47 = vrot.slane %v490_v1, %v2366_v2 }
 0x104   : > { %v521_v11 = vpop.permute.xlu1 %520  ;;  %577 = vperm.xlu1 %1970, %v540_v20   ;;  %v912_v20 = vrot.slane %v490_v1, %v2354_v60  ;;  %v933_v10 = vrot.slane %v490_v1, %v2374_v6  ;;  %v926_v52 = vrot.slane %v490_v1, %v2362_v0 }
 0x105   : > { %v543_v21 = vmul.f32 %v521_v11, %v479_v14  ;;  %v551_v53 = vmul.f32 %v521_v11, %v483_v32  ;;  %v863_v14 = vrot.slane %v489_v27, %v2366_v2  ;;  %v940_v11 = vrot.slane %v490_v1, %v2370_v4 }
 0x107   : > { %586 = vperm.xlu0 %1969, %v543_v21   ;;  %v2498_v21 = vpop.permute.xlu0 %725 }
 0x108   : > { %v529_v17 = vpop.permute.xlu1 %528  ;;  %583 = vperm.xlu1 %1970, %v542_v16  }
 0x109   : > { %v545_v23 = vmul.f32 %v529_v17, %v481_v7  ;;  %v553_v37 = vmul.f32 %v529_v17, %v485_v43  ;;  %v898_v7 = vrot.slane %v490_v1, %v2342_v56 }
 0x10b   : > { %592 = vperm.xlu0 %1969, %v545_v23   ;;  %v2502_v60 = vpop.permute.xlu0 %746 }
 0x10c   : > { %589 = vperm.xlu1 %1970, %v544_v31   ;;  %v2494_v62 = vpop.permute.xlu1 %732 }
 0x10f   : > { %598 = vperm.xlu0 %1969, %v547_v41   ;;  %v2506_v6 = vpop.permute.xlu0 %760 }
 0x110   : > { %595 = vperm.xlu1 %1970, %v546_v39   ;;  %v2496_v56 = vpop.permute.xlu1 %739  ;;  %v619_v39 = vand.u32 127, %v492_v49 }
 0x112   : > { %v624_v43 = vadd.s32 4294967288, %v619_v39 }
 0x113   : > { %604 = vperm.xlu0 %1969, %v549_v24   ;;  %v2510_v17 = vpop.permute.xlu0 %774 }
 0x114   : > { %601 = vperm.xlu1 %1970, %v548_v22   ;;  %v2500_v2 = vpop.permute.xlu1 %753  ;;  %v631_v22 = vadd.s32 4294967280, %v619_v39  ;;  %v627_v24 = vsub.s32 %v624_v43, %v2332_v50 }
 0x117   : > { %610 = vperm.xlu0 %1969, %v551_v53   ;;  %v2514_v19 = vpop.permute.xlu0 %788  ;;  %v638_v53 = vadd.s32 4294967272, %v619_v39 }
 0x118   : > { %607 = vperm.xlu1 %1970, %v550_v46   ;;  %v2504_v16 = vpop.permute.xlu1 %767 }
 0x11b   : > { %616 = vperm.xlu0 %1969, %v553_v37   ;;  %v2518_v31 = vpop.permute.xlu0 %802  ;;  %v2528_v37 = vsub.s32 %v619_v39, %v2332_v50 }
 0x11c   : > { %613 = vperm.xlu1 %1970, %v552_v28   ;;  %v2508_v0 = vpop.permute.xlu1 %781  ;;  %v634_v28 = vsub.s32 %v631_v22, %v2332_v50 }
 0x11f   : > { %830 = vbcast.lane.b32.xlu0 %v828_v30, 256  ;;  %v2522_v34 = vpop.permute.xlu0 %816  ;;  %v641_v30 = vsub.s32 %v638_v53, %v2332_v50 }
 0x120   : > { %837 = vbcast.lane.b32.xlu1 %v835_v33, 256  ;;  %v2512_v4 = vpop.permute.xlu1 %795 }
 0x123   : > { %844 = vbcast.lane.b32.xlu0 %v842_v58, 256 }
 0x124   : > { %851 = vbcast.lane.b32.xlu1 %v849_v12, 256  ;;  %v2516_v23 = vpop.permute.xlu1 %809 }
 0x127   : > { %858 = vbcast.lane.b32.xlu0 %v856_v15, 256 }
 0x128   : > { %865 = vbcast.lane.b32.xlu1 %v863_v14, 256  ;;  %v2520_v32 = vpop.permute.xlu1 %823 }
 0x12b   : > { %872 = vbcast.lane.b32.xlu0 %v870_v61, 256 }
 0x12c   : > { %879 = vbcast.lane.b32.xlu1 %v877_v59, 256 }
 0x12f   : > { %886 = vbcast.lane.b32.xlu0 %v884_v3, 256 }
 0x130   : > { %893 = vbcast.lane.b32.xlu1 %v891_v8, 256 }
 0x133   : > { %900 = vbcast.lane.b32.xlu0 %v898_v7, 256 }
 0x134   : > { %907 = vbcast.lane.b32.xlu1 %v905_v5, 256 }
 0x137   : > { %914 = vbcast.lane.b32.xlu0 %v912_v20, 256 }
 0x138   : > { %921 = vbcast.lane.b32.xlu1 %v919_v47, 256 }
 0x13b   : > { %928 = vbcast.lane.b32.xlu0 %v926_v52, 256 }
 0x13c   : > { %935 = vbcast.lane.b32.xlu1 %v933_v10, 256 }
 0x13f   : > { %942 = vbcast.lane.b32.xlu0 %v940_v11, 256 }
 0x177   : > { %v572_v41 = vpop.permute.xlu0 %571 }
 0x178   : > { %v623_v14 = vrot.slane %v572_v41, %v2528_v37 }
 0x17f   : > { %v575_v44 = vpop.permute.xlu1 %574 }
 0x180   : > { %v628_v33 = vrot.slane %v575_v44, %v627_v24 }
 0x182   : > { %v581_v27 = vpop.permute.xlu0 %580  ;;  %v630_v61 = vsel %vm629_vm0, %v628_v33, %v623_v14 }
 0x183   : > { %v578_v46 = vpop.permute.xlu1 %577  ;;  %v642_v1 = vrot.slane %v581_v27, %v641_v30 }
 0x184   : > { %v635_v49 = vrot.slane %v578_v46, %v634_v28 }
 0x186   : > { %v587_v58 = vpop.permute.xlu0 %586  ;;  %v637_v47 = vsel %vm636_vm1, %v635_v49, %v630_v61 }
 0x187   : > { %v584_v12 = vpop.permute.xlu1 %583  ;;  %v652_v59 = vrot.slane %v587_v58, %v627_v24  ;;  %v644_v11 = vsel %vm643_vm2, %v642_v1, %v637_v47 }
 0x188   : > { %v648_v15 = vrot.slane %v584_v12, %v2528_v37 }
 0x18a   : > { %v593_v3 = vpop.permute.xlu0 %592  ;;  %v653_v50 = vsel %vm629_vm0, %v652_v59, %v648_v15 }
 0x18b   : > { %v590_v8 = vpop.permute.xlu1 %589  ;;  %v662_v7 = vrot.slane %v593_v3, %v641_v30 }
 0x18c   : > { %v657_v5 = vrot.slane %v590_v8, %v634_v28 }
 0x18e   : > { %v658_v20 = vsel %vm636_vm1, %v657_v5, %v653_v50  ;;  %v599_v52 = vpop.permute.xlu0 %598 }
 0x18f   : > { %v596_v10 = vpop.permute.xlu1 %595  ;;  %v663_v39 = vsel %vm643_vm2, %v662_v7, %v658_v20  ;;  %v671_v53 = vrot.slane %v599_v52, %v627_v24 }
 0x190   : > { %v703_v41 = vsel %vm702_vm3, %v663_v39, %v644_v11  ;;  %v667_v46 = vrot.slane %v596_v10, %v2528_v37 }
 0x191   : > { %v708_v43 = vsel %vm707_vm4, %v703_v41, 0.0 }
 0x192   : > { %709 = vadd.xlane.f32.xlu1 %v708_v43  ;;  %v605_v22 = vpop.permute.xlu0 %604  ;;  %v672_v14 = vsel %vm629_vm0, %v671_v53, %v667_v46 }
 0x193   : > { %v602_v44 = vpop.permute.xlu1 %601  ;;  %v681_v15 = vrot.slane %v605_v22, %v641_v30 }
 0x194   : > { %v676_v12 = vrot.slane %v602_v44, %v634_v28 }
 0x196   : > { %v611_v33 = vpop.permute.xlu0 %610  ;;  %v677_v1 = vsel %vm636_vm1, %v676_v12, %v672_v14 }
 0x197   : > { %v608_v27 = vpop.permute.xlu1 %607  ;;  %v690_v49 = vrot.slane %v611_v33, %v627_v24  ;;  %v682_v47 = vsel %vm643_vm2, %v681_v15, %v677_v1 }
 0x198   : > { %v686_v58 = vrot.slane %v608_v27, %v2528_v37 }
 0x19a   : > { %v617_v61 = vpop.permute.xlu0 %616  ;;  %v691_v5 = vsel %vm629_vm0, %v690_v49, %v686_v58 }
 0x19b   : > { %v614_v59 = vpop.permute.xlu1 %613  ;;  %v700_v3 = vrot.slane %v617_v61, %v641_v30 }
 0x19c   : > { %v695_v8 = vrot.slane %v614_v59, %v634_v28 }
 0x19e   : > { %v696_v7 = vsel %vm636_vm1, %v695_v8, %v691_v5  ;;  %v2555_v11 = vpop.permute.xlu0 %830 }
 0x19f   : > { %v701_v50 = vsel %vm643_vm2, %v700_v3, %v696_v7  ;;  %v2551_v10 = vpop.permute.xlu1 %837 }
 0x1a0   : > { %v704_v20 = vsel %vm702_vm3, %v701_v50, %v682_v47 }
 0x1a1   : > { %v711_v24 = vsel %vm707_vm4, %v704_v20, 0.0 }
 0x1a2   : > { %712 = vadd.xlane.f32.xlu0 %v711_v24  ;;  %v2559_v30 = vpop.permute.xlu0 %844 }
 0x1a3   : > { %v2553_v52 = vpop.permute.xlu1 %851 }
 0x1a6   : > { %v2563_v41 = vpop.permute.xlu0 %858 }
 0x1a7   : > { %v2557_v28 = vpop.permute.xlu1 %865 }
 0x1aa   : > { %v2567_v44 = vpop.permute.xlu0 %872 }
 0x1ab   : > { %v2561_v39 = vpop.permute.xlu1 %879 }
 0x1ae   : > { %v2571_v46 = vpop.permute.xlu0 %886 }
 0x1af   : > { %v2565_v43 = vpop.permute.xlu1 %893 }
 0x1b2   : > { %v2575_v27 = vpop.permute.xlu0 %900 }
 0x1b3   : > { %v2569_v22 = vpop.permute.xlu1 %907 }
 0x1b6   : > { %v2579_v12 = vpop.permute.xlu0 %914 }
 0x1b7   : > { %v2573_v53 = vpop.permute.xlu1 %921 }
 0x1ba   : > { %v2583_v14 = vpop.permute.xlu0 %928 }
 0x1bb   : > { %v2577_v33 = vpop.permute.xlu1 %935 }
 0x1be   : > { %v943_v8 = vpop.permute.xlu0 %942 }
 0x21f   : > { %v710_v58 = vpop.xlane.xlu1 %709 }
 0x220   : > { %v2581_v49 = vmax.f32 %v710_v58, 0.0 }
 0x222   : > { %v976_v15 = vmul.f32 %v2498_v21, %v2581_v49  ;;  %v977_v59 = vmul.f32 %v2494_v62, %v2581_v49  ;;  %v978_v61 = vmul.f32 %v2496_v56, %v2581_v49  ;;  %v979_v1 = vmul.f32 %v2502_v60, %v2581_v49 }
 0x223   : > { %v2595_v3 = vmul.f32 %v2577_v33, %v2581_v49  ;;  %v2598_v5 = vmul.f32 %v943_v8, %v2581_v49  ;;  %v980_v7 = vmul.f32 %v2500_v2, %v2581_v49  ;;  %v981_v47 = vmul.f32 %v2506_v6, %v2581_v49 }
 0x224   : > { %1105 = vperm.xlu1 %1970, %v976_v15   ;;  %1108 = vperm.xlu0 %1969, %v977_v59   ;;  %v982_v50 = vmul.f32 %v2504_v16, %v2581_v49  ;;  %v983_v20 = vmul.f32 %v2510_v17, %v2581_v49  ;;  %v984_v24 = vmul.f32 %v2508_v0, %v2581_v49 }
 0x225   : > { %v985_v15 = vmul.f32 %v2514_v19, %v2581_v49 }
 0x228   : > { %1111 = vperm.xlu1 %1970, %v978_v61   ;;  %1114 = vperm.xlu0 %1969, %v979_v1   ;;  %v986_v61 = vmul.f32 %v2512_v4, %v2581_v49  ;;  %v987_v1 = vmul.f32 %v2518_v31, %v2581_v49 }
 0x22c   : > { %1117 = vperm.xlu1 %1970, %v980_v7   ;;  %1120 = vperm.xlu0 %1969, %v981_v47   ;;  %v988_v47 = vmul.f32 %v2516_v23, %v2581_v49 }
 0x22f   : > { %v713_v58 = vpop.xlane.xlu0 %712 }
 0x230   : > { %1123 = vperm.xlu1 %1970, %v982_v50   ;;  %1126 = vperm.xlu0 %1969, %v983_v20   ;;  %v2612_v59 = vmax.f32 %v713_v58, 0.0  ;;  %v989_v50 = vmul.f32 %v2522_v34, %v2581_v49  ;;  %v990_v20 = vmul.f32 %v2520_v32, %v2581_v49  ;;  %v993_v58 = vmul.f32 %v2559_v30, %v2581_v49 }
 0x232   : > { %v2619_v7 = vmul.f32 %v943_v8, %v2612_v59  ;;  %v992_v8 = vmul.f32 %v2551_v10, %v2581_v49 }
 0x234   : > { %1129 = vperm.xlu1 %1970, %v984_v24   ;;  %1132 = vperm.xlu0 %1969, %v985_v15   ;;  %v991_v24 = vmul.f32 %v2555_v11, %v2581_v49  ;;  %v994_v15 = vmul.f32 %v2553_v52, %v2581_v49 }
 0x238   : > { %1135 = vperm.xlu1 %1970, %v986_v61   ;;  %1138 = vperm.xlu0 %1969, %v987_v1   ;;  %v995_v61 = vmul.f32 %v2563_v41, %v2581_v49  ;;  %v996_v1 = vmul.f32 %v2557_v28, %v2581_v49 }
 0x23c   : > { %1141 = vperm.xlu1 %1970, %v988_v47   ;;  %1144 = vperm.xlu0 %1969, %v989_v50   ;;  %v997_v47 = vmul.f32 %v2567_v44, %v2581_v49  ;;  %v998_v50 = vmul.f32 %v2561_v39, %v2581_v49 }
 0x240   : > { %1147 = vperm.xlu1 %1970, %v990_v20   ;;  %1150 = vperm.xlu0 %1969, %v991_v24   ;;  %v999_v20 = vmul.f32 %v2571_v46, %v2581_v49  ;;  %v1000_v24 = vmul.f32 %v2565_v43, %v2581_v49 }
 0x244   : > { %1153 = vperm.xlu1 %1970, %v992_v8   ;;  %1156 = vperm.xlu0 %1969, %v993_v58   ;;  %v1001_v8 = vmul.f32 %v2575_v27, %v2581_v49  ;;  %v1002_v58 = vmul.f32 %v2569_v22, %v2581_v49 }
 0x248   : > { %1159 = vperm.xlu1 %1970, %v994_v15   ;;  %1162 = vperm.xlu0 %1969, %v995_v61   ;;  %v1003_v15 = vmul.f32 %v2579_v12, %v2581_v49  ;;  %v1008_v61 = vmul.f32 %v2498_v21, %v2612_v59  ;;  %v1033_v21 = vmul.f32 %v2575_v27, %v2612_v59 }
 0x249   : > { %v1019_v27 = vmul.f32 %v2518_v31, %v2612_v59  ;;  %v1028_v31 = vmul.f32 %v2557_v28, %v2612_v59  ;;  %v1037_v28 = vmul.f32 %v2583_v14, %v2612_v59 }
 0x24c   : > { %1165 = vperm.xlu1 %1970, %v996_v1   ;;  %1168 = vperm.xlu0 %1969, %v997_v47   ;;  %v1009_v1 = vmul.f32 %v2494_v62, %v2612_v59  ;;  %v1016_v47 = vmul.f32 %v2508_v0, %v2612_v59  ;;  %v1032_v62 = vmul.f32 %v2565_v43, %v2612_v59 }
 0x24d   : > { %v1010_v0 = vmul.f32 %v2496_v56, %v2612_v59  ;;  %v1011_v43 = vmul.f32 %v2502_v60, %v2612_v59  ;;  %v1027_v56 = vmul.f32 %v2563_v41, %v2612_v59  ;;  %v1020_v60 = vmul.f32 %v2516_v23, %v2612_v59 }
 0x24e   : > { %v1036_v41 = vmul.f32 %v2573_v53, %v2612_v59  ;;  %v1029_v23 = vmul.f32 %v2567_v44, %v2612_v59  ;;  %v1038_v44 = vmul.f32 %v2577_v33, %v2612_v59 }
 0x250   : > { %1171 = vperm.xlu1 %1970, %v998_v50   ;;  %1174 = vperm.xlu0 %1969, %v999_v20   ;;  %v1017_v50 = vmul.f32 %v2514_v19, %v2612_v59  ;;  %v1024_v20 = vmul.f32 %v2551_v10, %v2612_v59  ;;  %v1018_v19 = vmul.f32 %v2512_v4, %v2612_v59 }
 0x251   : > { %v1026_v10 = vmul.f32 %v2553_v52, %v2612_v59  ;;  %v1035_v4 = vmul.f32 %v2579_v12, %v2612_v59  ;;  %v1004_v52 = vmul.f32 %v2573_v53, %v2581_v49  ;;  %v1005_v12 = vmul.f32 %v2583_v14, %v2581_v49 }
 0x252   : > { %v1014_v53 = vmul.f32 %v2504_v16, %v2612_v59  ;;  %v1015_v16 = vmul.f32 %v2510_v17, %v2612_v59  ;;  %v1023_v49 = vmul.f32 %v2555_v11, %v2612_v59 }
 0x254   : > { %1177 = vperm.xlu1 %1970, %v1000_v24   ;;  %1180 = vperm.xlu0 %1969, %v1001_v8   ;;  %v1025_v24 = vmul.f32 %v2559_v30, %v2612_v59  ;;  %v1034_v30 = vmul.f32 %v2569_v22, %v2612_v59  ;;  %v1012_v22 = vmul.f32 %v2500_v2, %v2612_v59 }
 0x255   : > { %v1013_v2 = vmul.f32 %v2506_v6, %v2612_v59  ;;  %v1021_v8 = vmul.f32 %v2522_v34, %v2612_v59  ;;  %v1022_v6 = vmul.f32 %v2520_v32, %v2612_v59  ;;  %v1030_v34 = vmul.f32 %v2561_v39, %v2612_v59 }
 0x256   : > { %v1031_v32 = vmul.f32 %v2571_v46, %v2612_v59 }
 0x258   : > { %1183 = vperm.xlu1 %1970, %v1002_v58   ;;  %1186 = vperm.xlu0 %1969, %v1003_v15  }
 0x25c   : > { %1201 = vperm.xlu1 %1970, %v1008_v61   ;;  %1204 = vperm.xlu0 %1969, %v1009_v1  }
 0x260   : > { %1225 = vperm.xlu1 %1970, %v1016_v47   ;;  %1228 = vperm.xlu0 %1969, %v1017_v50  }
 0x264   : > { %1249 = vperm.xlu1 %1970, %v1024_v20   ;;  %1252 = vperm.xlu0 %1969, %v1025_v24  }
 0x268   : > { %1273 = vperm.xlu1 %1970, %v1032_v62   ;;  %1276 = vperm.xlu0 %1969, %v1033_v21  }
 0x26c   : > { %1207 = vperm.xlu1 %1970, %v1010_v0   ;;  %1231 = vperm.xlu0 %1969, %v1018_v19  }
 0x270   : > { %1255 = vperm.xlu1 %1970, %v1026_v10   ;;  %1279 = vperm.xlu0 %1969, %v1034_v30  }
 0x274   : > { %1210 = vperm.xlu1 %1970, %v1011_v43   ;;  %1234 = vperm.xlu0 %1969, %v1019_v27  }
 0x278   : > { %1258 = vperm.xlu1 %1970, %v1027_v56   ;;  %1282 = vperm.xlu0 %1969, %v1035_v4  }
 0x27c   : > { %1189 = vperm.xlu1 %1970, %v1004_v52   ;;  %1213 = vperm.xlu0 %1969, %v1012_v22  }
 0x280   : > { %1237 = vperm.xlu1 %1970, %v1020_v60   ;;  %1261 = vperm.xlu0 %1969, %v1028_v31  }
 0x284   : > { %1285 = vperm.xlu1 %1970, %v1036_v41   ;;  %1192 = vperm.xlu0 %1969, %v1005_v12  }
 0x288   : > { %1216 = vperm.xlu1 %1970, %v1013_v2   ;;  %1240 = vperm.xlu0 %1969, %v1021_v8  }
 0x28c   : > { %1264 = vperm.xlu1 %1970, %v1029_v23   ;;  %1288 = vperm.xlu0 %1969, %v1037_v28  }
 0x290   : > { %1195 = vperm.xlu1 %1970, %v2595_v3   ;;  %1219 = vperm.xlu0 %1969, %v1014_v53  }
 0x294   : > { %1243 = vperm.xlu1 %1970, %v1022_v6   ;;  %1267 = vperm.xlu0 %1969, %v1030_v34  }
 0x298   : > { %1291 = vperm.xlu1 %1970, %v1038_v44   ;;  %1198 = vperm.xlu0 %1969, %v2598_v5  }
 0x29c   : > { %1222 = vperm.xlu1 %1970, %v1015_v16   ;;  %1246 = vperm.xlu0 %1969, %v1023_v49  }
 0x2a0   : > { %1270 = vperm.xlu1 %1970, %v1031_v32   ;;  %1294 = vperm.xlu0 %1969, %v2619_v7  }
 0x2a3   : > { %v1106_v39 = vpop.permute.xlu1 %1105  ;;  %v1109_v14 = vpop.permute.xlu0 %1108 }
 0x2a4   : > { %v1299_v17 = vrot.slane %v1106_v39, %v2528_v37  ;;  %v1303_v61 = vrot.slane %v1109_v14, %v2528_v37 }
 0x2a6   : > { %v1552_v46 = vsel %vm702_vm3, %v1303_v61, %v1299_v17 }
 0x2a7   : > { %v1112_v33 = vpop.permute.xlu1 %1111  ;;  %v1115_v3 = vpop.permute.xlu0 %1114 }
 0x2a8   : > { %v1307_v1 = vrot.slane %v1112_v33, %v2528_v37  ;;  %v1311_v59 = vrot.slane %v1115_v3, %v2528_v37 }
 0x2aa   : > { %v1554_v50 = vsel %vm1553_vm5, %v1307_v1, %v1552_v46 }
 0x2ab   : > { %v1118_v58 = vpop.permute.xlu1 %1117  ;;  %v1121_v5 = vpop.permute.xlu0 %1120  ;;  %v1556_v0 = vsel %vm1555_vm6, %v1311_v59, %v1554_v50 }
 0x2ac   : > { %v1315_v20 = vrot.slane %v1118_v58, %v2528_v37  ;;  %v1319_v19 = vrot.slane %v1121_v5, %v2528_v37 }
 0x2ae   : > { %v1558_v43 = vsel %vm1557_vm7, %v1315_v20, %v1556_v0 }
 0x2af   : > { %v1124_v15 = vpop.permute.xlu1 %1123  ;;  %v1127_v11 = vpop.permute.xlu0 %1126  ;;  %v1560_v60 = vsel %vm1559_vm8, %v1319_v19, %v1558_v43 }
 0x2b0   : > { %v1323_v27 = vrot.slane %v1124_v15, %v2528_v37  ;;  %v1327_v31 = vrot.slane %v1127_v11, %v2528_v37 }
 0x2b2   : > { %v1562_v23 = vsel %vm1561_vm9, %v1323_v27, %v1560_v60 }
 0x2b3   : > { %v1130_v47 = vpop.permute.xlu1 %1129  ;;  %v1133_v7 = vpop.permute.xlu0 %1132  ;;  %v1564_v44 = vsel %vm1563_vm10, %v1327_v31, %v1562_v23 }
 0x2b4   : > { %v1331_v24 = vrot.slane %v1130_v47, %v2528_v37  ;;  %v1335_v62 = vrot.slane %v1133_v7, %v2528_v37  ;;  %v1623_v14 = vsel %vm1622_vm11, %v1564_v44, 0.0 }
 0x2b6   : > { %v1565_v56 = vsel %vm702_vm3, %v1335_v62, %v1331_v24 }
 0x2b7   : > { %v1136_v21 = vpop.permute.xlu1 %1135  ;;  %v1139_v30 = vpop.permute.xlu0 %1138 }
 0x2b8   : > { %v1339_v10 = vrot.slane %v1136_v21, %v2528_v37  ;;  %v1343_v4 = vrot.slane %v1139_v30, %v2528_v37 }
 0x2ba   : > { %v1566_v52 = vsel %vm1553_vm5, %v1339_v10, %v1565_v56 }
 0x2bb   : > { %v1142_v22 = vpop.permute.xlu1 %1141  ;;  %v1145_v12 = vpop.permute.xlu0 %1144  ;;  %v1567_v2 = vsel %vm1555_vm6, %v1343_v4, %v1566_v52 }
 0x2bc   : > { %v1347_v41 = vrot.slane %v1142_v22, %v2528_v37  ;;  %v1351_v8 = vrot.slane %v1145_v12, %v2528_v37 }
 0x2be   : > { %v1568_v28 = vsel %vm1557_vm7, %v1347_v41, %v1567_v2 }
 0x2bf   : > { %v1148_v53 = vpop.permute.xlu1 %1147  ;;  %v1151_v34 = vpop.permute.xlu0 %1150  ;;  %v1569_v16 = vsel %vm1559_vm8, %v1351_v8, %v1568_v28 }
 0x2c0   : > { %v1355_v6 = vrot.slane %v1148_v53, %v2528_v37  ;;  %v1359_v49 = vrot.slane %v1151_v34, %v2528_v37 }
 0x2c2   : > { %v1570_v32 = vsel %vm1561_vm9, %v1355_v6, %v1569_v16 }
 0x2c3   : > { %v1154_v39 = vpop.permute.xlu1 %1153  ;;  %v1571_v33 = vsel %vm1563_vm10, %v1359_v49, %v1570_v32  ;;  %v1157_v3 = vpop.permute.xlu0 %1156 }
 0x2c4   : > { %1624 = vadd.xlane.f32.xlu1 %v1623_v14  ;;  %v1626_v58 = vsel %vm1622_vm11, %v1571_v33, 0.0  ;;  %v1363_v5 = vrot.slane %v1154_v39, %v2528_v37  ;;  %v1367_v15 = vrot.slane %v1157_v3, %v2528_v37 }
 0x2c5   : > { %1627 = vadd.xlane.f32.xlu0 %v1626_v58 }
 0x2c6   : > { %v1572_v1 = vsel %vm702_vm3, %v1367_v15, %v1363_v5 }
 0x2c7   : > { %v1160_v17 = vpop.permute.xlu1 %1159  ;;  %v1163_v11 = vpop.permute.xlu0 %1162 }
 0x2c8   : > { %v1371_v61 = vrot.slane %v1160_v17, %v2528_v37  ;;  %v1375_v47 = vrot.slane %v1163_v11, %v2528_v37 }
 0x2ca   : > { %v1573_v46 = vsel %vm1553_vm5, %v1371_v61, %v1572_v1 }
 0x2cb   : > { %v1166_v59 = vpop.permute.xlu1 %1165  ;;  %v1169_v50 = vpop.permute.xlu0 %1168  ;;  %v1574_v20 = vsel %vm1555_vm6, %v1375_v47, %v1573_v46 }
 0x2cc   : > { %v1379_v7 = vrot.slane %v1166_v59, %v2528_v37  ;;  %v1383_v24 = vrot.slane %v1169_v50, %v2528_v37 }
 0x2ce   : > { %v1575_v62 = vsel %vm1557_vm7, %v1379_v7, %v1574_v20 }
 0x2cf   : > { %v1172_v21 = vpop.permute.xlu1 %1171  ;;  %v1175_v19 = vpop.permute.xlu0 %1174  ;;  %v1576_v10 = vsel %vm1559_vm8, %v1383_v24, %v1575_v62 }
 0x2d0   : > { %v1387_v0 = vrot.slane %v1172_v21, %v2528_v37  ;;  %v1391_v30 = vrot.slane %v1175_v19, %v2528_v37 }
 0x2d2   : > { %v1577_v43 = vsel %vm1561_vm9, %v1387_v0, %v1576_v10 }
 0x2d3   : > { %v1178_v27 = vpop.permute.xlu1 %1177  ;;  %v1578_v56 = vsel %vm1563_vm10, %v1391_v30, %v1577_v43  ;;  %v1181_v4 = vpop.permute.xlu0 %1180 }
 0x2d4   : > { %v1629_v52 = vsel %vm1622_vm11, %v1578_v56, 0.0  ;;  %v1395_v1 = vrot.slane %v1178_v27, %v2528_v37  ;;  %v1399_v47 = vrot.slane %v1181_v4, %v2528_v37 }
 0x2d5   : > { %1630 = vadd.xlane.f32.xlu0 %v1629_v52 }
 0x2d6   : > { %v1579_v50 = vsel %vm702_vm3, %v1399_v47, %v1395_v1 }
 0x2d7   : > { %v1184_v22 = vpop.permute.xlu1 %1183  ;;  %v1187_v60 = vpop.permute.xlu0 %1186 }
 0x2d8   : > { %v1403_v46 = vrot.slane %v1184_v22, %v2528_v37  ;;  %v1407_v24 = vrot.slane %v1187_v60, %v2528_v37 }
 0x2da   : > { %v1580_v20 = vsel %vm1553_vm5, %v1403_v46, %v1579_v50 }
 0x2db   : > { %v1202_v31 = vpop.permute.xlu1 %1201  ;;  %v1205_v41 = vpop.permute.xlu0 %1204 }
 0x2dc   : > { %v1427_v62 = vrot.slane %v1202_v31, %v2528_v37  ;;  %v1431_v0 = vrot.slane %v1205_v41, %v2528_v37  ;;  %v1581_v31 = vsel %vm1555_vm6, %v1407_v24, %v1580_v20 }
 0x2df   : > { %v1226_v12 = vpop.permute.xlu1 %1225  ;;  %v1229_v2 = vpop.permute.xlu0 %1228 }
 0x2e0   : > { %v1459_v19 = vrot.slane %v1226_v12, %v2528_v37  ;;  %v1463_v10 = vrot.slane %v1229_v2, %v2528_v37 }
 0x2e3   : > { %v1250_v8 = vpop.permute.xlu1 %1249  ;;  %v1253_v23 = vpop.permute.xlu0 %1252 }
 0x2e4   : > { %v1491_v30 = vrot.slane %v1250_v8, %v2528_v37  ;;  %v1495_v27 = vrot.slane %v1253_v23, %v2528_v37  ;;  %v1586_v8 = vsel %vm702_vm3, %v1431_v0, %v1427_v62  ;;  %v1593_v23 = vsel %vm702_vm3, %v1463_v10, %v1459_v19 }
 0x2e7   : > { %v1274_v28 = vpop.permute.xlu1 %1273  ;;  %v1277_v53 = vpop.permute.xlu0 %1276 }
 0x2e8   : > { %v1523_v56 = vrot.slane %v1274_v28, %v2528_v37  ;;  %v1527_v4 = vrot.slane %v1277_v53, %v2528_v37 }
 0x2eb   : > { %v1208_v6 = vpop.permute.xlu1 %1207  ;;  %v1232_v34 = vpop.permute.xlu0 %1231 }
 0x2ec   : > { %v1435_v52 = vrot.slane %v1208_v6, %v2528_v37  ;;  %v1467_v22 = vrot.slane %v1232_v34, %v2528_v37  ;;  %v1600_v34 = vsel %vm702_vm3, %v1495_v27, %v1491_v30 }
 0x2ee   : > { %v1587_v1 = vsel %vm1553_vm5, %v1435_v52, %v1586_v8 }
 0x2ef   : > { %v1256_v44 = vpop.permute.xlu1 %1255  ;;  %v1280_v16 = vpop.permute.xlu0 %1279 }
 0x2f0   : > { %v1499_v60 = vrot.slane %v1256_v44, %v2528_v37  ;;  %v1531_v41 = vrot.slane %v1280_v16, %v2528_v37  ;;  %v1607_v44 = vsel %vm702_vm3, %v1527_v4, %v1523_v56 }
 0x2f2   : > { %v1601_v47 = vsel %vm1553_vm5, %v1499_v60, %v1600_v34 }
 0x2f3   : > { %v1211_v49 = vpop.permute.xlu1 %1210  ;;  %v1235_v32 = vpop.permute.xlu0 %1234 }
 0x2f4   : > { %v1439_v12 = vrot.slane %v1211_v49, %v2528_v37  ;;  %v1471_v28 = vrot.slane %v1235_v32, %v2528_v37  ;;  %v1594_v49 = vsel %vm1553_vm5, %v1467_v22, %v1593_v23  ;;  %v1608_v32 = vsel %vm1553_vm5, %v1531_v41, %v1607_v44 }
 0x2f7   : > { %v2770_v39 = vpop.permute.xlu1 %1258  ;;  %v2772_v14 = vpop.permute.xlu0 %1282 }
 0x2f8   : > { %v1503_v0 = vrot.slane %v2770_v39, %v2528_v37  ;;  %v1535_v10 = vrot.slane %v2772_v14, %v2528_v37 }
 0x2fa   : > { %v1609_v44 = vsel %vm1555_vm6, %v1535_v10, %v1608_v32 }
 0x2fb   : > { %v1190_v33 = vpop.permute.xlu1 %1189  ;;  %v1214_v3 = vpop.permute.xlu0 %1213 }
 0x2fc   : > { %v1411_v53 = vrot.slane %v1190_v33, %v2528_v37  ;;  %v1443_v46 = vrot.slane %v1214_v3, %v2528_v37  ;;  %v1588_v33 = vsel %vm1555_vm6, %v1439_v12, %v1587_v1 }
 0x2fe   : > { %v1582_v19 = vsel %vm1557_vm7, %v1411_v53, %v1581_v31  ;;  %v1589_v27 = vsel %vm1557_vm7, %v1443_v46, %v1588_v33 }
 0x2ff   : > { %v2774_v58 = vpop.permute.xlu1 %1237  ;;  %v2776_v5 = vpop.permute.xlu0 %1261 }
 0x300   : > { %v1475_v20 = vrot.slane %v2774_v58, %v2528_v37  ;;  %v1507_v39 = vrot.slane %v2776_v5, %v2528_v37 }
 0x303   : > { %v2778_v15 = vpop.permute.xlu1 %1285  ;;  %v1193_v17 = vpop.permute.xlu0 %1192 }
 0x304   : > { %v1415_v16 = vrot.slane %v1193_v17, %v2528_v37  ;;  %v1595_v17 = vsel %vm1555_vm6, %v1471_v28, %v1594_v49  ;;  %v1539_v14 = vrot.slane %v2778_v15, %v2528_v37  ;;  %v1602_v28 = vsel %vm1555_vm6, %v1503_v0, %v1601_v47 }
 0x305   : > { %v1603_v1 = vsel %vm1557_vm7, %v1507_v39, %v1602_v28 }
 0x306   : > { %v1583_v30 = vsel %vm1559_vm8, %v1415_v16, %v1582_v19  ;;  %v1610_v49 = vsel %vm1557_vm7, %v1539_v14, %v1609_v44  ;;  %v2016_v44 = vld [vmem:[%s2266_s28 + $0x28] sm:$0xff] }
 0x307   : > { %v1217_v61 = vpop.permute.xlu1 %1216  ;;  %v2780_v11 = vpop.permute.xlu0 %1240 }
 0x308   : > { %v1447_v24 = vrot.slane %v1217_v61, %v2528_v37  ;;  %v1479_v3 = vrot.slane %v2780_v11, %v2528_v37  ;;  %v1596_v11 = vsel %vm1557_vm7, %v1475_v20, %v1595_v17 }
 0x30a   : > { %v1590_v52 = vsel %vm1559_vm8, %v1447_v24, %v1589_v27  ;;  %v1597_v60 = vsel %vm1559_vm8, %v1479_v3, %v1596_v11  ;;  %v2011_v11 = vld [vmem:[%s2266_s28] sm:$0xff] }
 0x30b   : > { %v2785_v59 = vpop.permute.xlu1 %1264  ;;  %v2787_v7 = vpop.permute.xlu0 %1288  ;;  %v1695_v14 = vmul.f32 %v2011_v11, %v2422_v40 }
 0x30c   : > { %v1511_v31 = vrot.slane %v2785_v59, %v2528_v37 }
 0x30e   : > { %v1604_v46 = vsel %vm1559_vm8, %v1511_v31, %v1603_v1  ;;  %v2014_v31 = vld [vmem:[%s2266_s28 + $0x18] sm:$0xff]  ;;  %v1700_v1 = vmul.f32 %v2016_v44, %v2434_v48 }
 0x30f   : > { %v1196_v21 = vpop.permute.xlu1 %1195  ;;  %v1220_v43 = vpop.permute.xlu0 %1219 }
 0x310   : > { %v1419_v50 = vrot.slane %v1196_v21, %v2528_v37  ;;  %v1451_v58 = vrot.slane %v1220_v43, %v2528_v37 }
 0x312   : > { %v1584_v4 = vsel %vm1561_vm9, %v1419_v50, %v1583_v30  ;;  %v1591_v23 = vsel %vm1561_vm9, %v1451_v58, %v1590_v52  ;;  %v2012_v52 = vld [vmem:[%s2266_s28 + $0x8] sm:$0xff] }
 0x313   : > { %v1244_v2 = vpop.permute.xlu1 %1243  ;;  %v1268_v6 = vpop.permute.xlu0 %1267 }
 0x314   : > { %v1483_v56 = vrot.slane %v1244_v2, %v2528_v37  ;;  %v1543_v2 = vrot.slane %v2787_v7, %v2528_v37  ;;  %v1515_v15 = vrot.slane %v1268_v6, %v2528_v37 }
 0x316   : > { %v1598_v34 = vsel %vm1561_vm9, %v1483_v56, %v1597_v60  ;;  %v1611_v20 = vsel %vm1559_vm8, %v1543_v2, %v1610_v49  ;;  %v1605_v24 = vsel %vm1561_vm9, %v1515_v15, %v1604_v46 }
 0x317   : > { %v1292_v62 = vpop.permute.xlu1 %1291  ;;  %v1199_v21 = vpop.permute.xlu0 %1198 }
 0x318   : > { %v1423_v61 = vrot.slane %v1199_v21, %v2528_v37  ;;  %v1547_v53 = vrot.slane %v1292_v62, %v2528_v37 }
 0x31a   : > { %v1585_v43 = vsel %vm1563_vm10, %v1423_v61, %v1584_v4  ;;  %v1612_v17 = vsel %vm1561_vm9, %v1547_v53, %v1611_v20 }
 0x31b   : > { %v1223_v22 = vpop.permute.xlu1 %1222  ;;  %v1247_v41 = vpop.permute.xlu0 %1246  ;;  %v1632_v12 = vsel %vm1622_vm11, %v1585_v43, 0.0  ;;  %v2013_v43 = vld [vmem:[%s2266_s28 + $0x10] sm:$0xff] }
 0x31c   : > { %v1455_v5 = vrot.slane %v1223_v22, %v2528_v37  ;;  %v1487_v8 = vrot.slane %v1247_v41, %v2528_v37  ;;  %1633 = vadd.xlane.f32.xlu0 %v1632_v12  ;;  %v1696_v22 = vmul.f32 %v2012_v52, %v2422_v40  ;;  %v1697_v60 = vmul.f32 %v2013_v43, %v2420_v36 }
 0x31d   : > { %v1711_v41 = vadd.f32 %v1695_v14, %v2440_v54 }
 0x31e   : > { %v1592_v59 = vsel %vm1563_vm10, %v1455_v5, %v1591_v23  ;;  %v1599_v16 = vsel %vm1563_vm10, %v1487_v8, %v1598_v34  ;;  %v1698_v5 = vmul.f32 %v2014_v31, %v2420_v36  ;;  %v1712_v12 = vadd.f32 %v1696_v22, %v2440_v54  ;;  %v2015_v54 = vld [vmem:[%s2266_s28 + $0x20] sm:$0xff]  ;;  %v2018_v31 = vld [vmem:[%s2266_s28 + $0x38] sm:$0xff] }
 0x31f   : > { %v1271_v7 = vpop.permute.xlu1 %1270  ;;  %v1635_v6 = vsel %vm1622_vm11, %v1592_v59, 0.0  ;;  %v1295_v50 = vpop.permute.xlu0 %1294  ;;  %v1638_v33 = vsel %vm1622_vm11, %v1599_v16, 0.0  ;;  %v1713_v15 = vadd.f32 %v1697_v60, %v2428_v45  ;;  %v1699_v34 = vmul.f32 %v2015_v54, %v2434_v48  ;;  %v2017_v60 = vld [vmem:[%s2266_s28 + $0x30] sm:$0xff] }
 0x320   : > { %v1519_v47 = vrot.slane %v1271_v7, %v2528_v37  ;;  %1636 = vadd.xlane.f32.xlu1 %v1635_v6  ;;  %v1551_v32 = vrot.slane %v1295_v50, %v2528_v37  ;;  %1639 = vadd.xlane.f32.xlu0 %v1638_v33  ;;  %v1714_v8 = vadd.f32 %v1698_v5, %v2428_v45 }
 0x321   : > { %v1715_v7 = vadd.f32 %v1699_v34, %v2460_v63  ;;  %v1716_v6 = vadd.f32 %v1700_v1, %v2460_v63  ;;  %v395_v50 = vadd.f32 %v2416_v51, %v2412_v35 }
 0x322   : > { %v1606_v62 = vsel %vm1563_vm10, %v1519_v47, %v1605_v24  ;;  %v1613_v19 = vsel %vm1563_vm10, %v1551_v32, %v1612_v17  ;;  %v391_v47 = vadd.f32 %v2405_v29, %v2397_v25 }
 0x323   : > { %v1641_v0 = vsel %vm1622_vm11, %v1606_v62, 0.0  ;;  %v1644_v3 = vsel %vm1622_vm11, %v1613_v19, 0.0  ;;  %v404_v20 = vmul.f32 0.001953125, %v395_v50 }
 0x324   : > { %1642 = vadd.xlane.f32.xlu1 %v1641_v0  ;;  %1645 = vadd.xlane.f32.xlu0 %v1644_v3  ;;  %v400_v33 = vmul.f32 0.001953125, %v391_v47 }
 0x326   : > { %v408_v32 = vmul.f32 %v400_v33, %v400_v33 }
 0x328   : > { %v412_v24 = vsub.f32 %v404_v20, %v408_v32 }
 0x32a   : > { %v416_v48 = vmax.f32 %v412_v24, 0.0 }
 0x32c   : > { %v420_v62 = vadd.f32 1e-09, %v416_v48 }
 0x351   : > { %v1625_v21 = vpop.xlane.xlu1 %1624 }
 0x352   : > { %v1902_v10 = vmul.f32 -1.442695, %v1625_v21  ;;  %v1628_v37 = vpop.xlane.xlu0 %1627 }
 0x353   : > { %v1903_v30 = vmul.f32 -1.442695, %v1628_v37 }
 0x354   : > { %1977 = vpow2.f32 %v1902_v10 }
 0x355   : > { %1979 = vpow2.f32 %v1903_v30 }
 0x35e   : > { %v1978_v58 = vpop.eup %1977 }
 0x35f   : > { %v1980_v61 = vpop.eup %1979  ;;  %v1671_v27 = vadd.f32 1.0, %v1978_v58 }
 0x360   : > { %v1672_v39 = vadd.f32 1.0, %v1980_v61 }
 0x361   : > { %1981 = vrcp.f32 %v1671_v27 }
 0x362   : > { %1983 = vrcp.f32 %v1672_v39  ;;  %v1631_v56 = vpop.xlane.xlu0 %1630 }
 0x363   : > { %v1904_v4 = vmul.f32 -1.442695, %v1631_v56 }
 0x365   : > { %1985 = vpow2.f32 %v1904_v4 }
 0x36b   : > { %v1982_v2 = vpop.eup %1981 }
 0x36c   : > { %v1984_v23 = vpop.eup %1983  ;;  %v1727_v28 = vmul.f32 %v1982_v2, %v1711_v41  ;;  %v1728_v40 = vmul.f32 %v1982_v2, %v1712_v12 }
 0x36d   : > { %v1729_v53 = vmul.f32 %v1984_v23, %v1713_v15  ;;  %v1730_v59 = vmul.f32 %v1984_v23, %v1714_v8 }
 0x36e   : > { %1743 = vst [vmem:[%s2888_s29] sm:$0xff] %v1727_v28  ;;  %1744 = vst [vmem:[%s2888_s29 + $0x8] sm:$0xff] %v1728_v40 }
 0x36f   : > { %v1986_v36 = vpop.eup %1985  ;;  %1745 = vst [vmem:[%s2888_s29 + $0x10] sm:$0xff] %v1729_v53  ;;  %1746 = vst [vmem:[%s2888_s29 + $0x18] sm:$0xff] %v1730_v59  ;;  %v2019_v53 = vld [vmem:[%s2266_s28 + $0x70] sm:$0xff] }
 0x370   : > { %v1673_v45 = vadd.f32 1.0, %v1986_v36  ;;  %v2020_v36 = vld [vmem:[%s2266_s28 + $0x78] sm:$0xff] }
 0x372   : > { %1987 = vrcp.f32 %v1673_v45 }
 0x373   : > { %1989 = vrsqrt.f32 %v420_v62 }
 0x37c   : > { %v1988_v16 = vpop.eup %1987 }
 0x37d   : > { %v1731_v49 = vmul.f32 %v1988_v16, %v1715_v7  ;;  %v1732_v46 = vmul.f32 %v1988_v16, %v1716_v6  ;;  %v1990_v51 = vpop.eup %1989 }
 0x37e   : > { %v468_v30 = vmul.f32 %v1990_v51, %v2418_v18 }
 0x37f   : > { %1747 = vst [vmem:[%s2888_s29 + $0x20] sm:$0xff] %v1731_v49  ;;  %1748 = vst [vmem:[%s2888_s29 + $0x28] sm:$0xff] %v1732_v46 }
 0x380   : > { %v472_v39 = vmul.f32 %v468_v30, %v400_v33  ;;  %v1701_v18 = vmul.f32 %v2017_v60, %v468_v30  ;;  %v1702_v5 = vmul.f32 %v2018_v31, %v468_v30  ;;  %v1709_v59 = vmul.f32 %v2019_v53, %v468_v30 }
 0x381   : > { %v1710_v45 = vmul.f32 %v2020_v36, %v468_v30 }
 0x382   : > { %v476_v52 = vsub.f32 %v2425_v42, %v472_v39 }
 0x384   : > { %v1717_v41 = vadd.f32 %v1701_v18, %v476_v52  ;;  %v1718_v12 = vadd.f32 %v1702_v5, %v476_v52  ;;  %v1725_v44 = vadd.f32 %v1709_v59, %v476_v52 }
 0x3a9   : > { %v1634_v17 = vpop.xlane.xlu0 %1633 }
 0x3aa   : > { %v1905_v63 = vmul.f32 -1.442695, %v1634_v17 }
 0x3ac   : > { %1991 = vpow2.f32 %v1905_v63 }
 0x3ad   : > { %v1637_v0 = vpop.xlane.xlu1 %1636  ;;  %v1640_v3 = vpop.xlane.xlu0 %1639 }
 0x3ae   : > { %v1906_v19 = vmul.f32 -1.442695, %v1637_v0  ;;  %v1907_v21 = vmul.f32 -1.442695, %v1640_v3 }
 0x3b0   : > { %1993 = vpow2.f32 %v1906_v19 }
 0x3b1   : > { %1995 = vpow2.f32 %v1907_v21  ;;  %v1643_v25 = vpop.xlane.xlu1 %1642  ;;  %v1646_v10 = vpop.xlane.xlu0 %1645 }
 0x3b2   : > { %v1908_v29 = vmul.f32 -1.442695, %v1643_v25  ;;  %v1909_v35 = vmul.f32 -1.442695, %v1646_v10 }
 0x3b4   : > { %1997 = vpow2.f32 %v1908_v29 }
 0x3b5   : > { %1999 = vpow2.f32 %v1909_v35 }
 0x3b6   : > { %v1992_v37 = vpop.eup %1991 }
 0x3b7   : > { %v1674_v58 = vadd.f32 1.0, %v1992_v37 }
 0x3b9   : > { %2001 = vrcp.f32 %v1674_v58 }
 0x3ba   : > { %v1994_v61 = vpop.eup %1993 }
 0x3bb   : > { %v1996_v27 = vpop.eup %1995  ;;  %v1675_v56 = vadd.f32 1.0, %v1994_v61 }
 0x3bc   : > { %v1676_v4 = vadd.f32 1.0, %v1996_v27 }
 0x3bd   : > { %2003 = vrcp.f32 %v1675_v56 }
 0x3be   : > { %v1998_v11 = vpop.eup %1997  ;;  %2005 = vrcp.f32 %v1676_v4 }
 0x3bf   : > { %v2000_v14 = vpop.eup %1999  ;;  %v1677_v22 = vadd.f32 1.0, %v1998_v11 }
 0x3c0   : > { %v1678_v43 = vadd.f32 1.0, %v2000_v14 }
 0x3c1   : > { %2007 = vrcp.f32 %v1677_v22 }
 0x3c2   : > { %2009 = vrcp.f32 %v1678_v43 }
 0x3c3   : > { %v2002_v2 = vpop.eup %2001 }
 0x3c4   : > { %v1733_v15 = vmul.f32 %v2002_v2, %v1717_v41  ;;  %v1734_v8 = vmul.f32 %v2002_v2, %v1718_v12 }
 0x3c6   : > { %1749 = vst [vmem:[%s2888_s29 + $0x30] sm:$0xff] %v1733_v15  ;;  %1750 = vst [vmem:[%s2888_s29 + $0x38] sm:$0xff] %v1734_v8 }
 0x3c7   : > { %v2004_v42 = vpop.eup %2003 }
 0x3c8   : > { %v2006_v23 = vpop.eup %2005  ;;  %v1735_v28 = vmul.f32 %v2004_v42, %v2449_v57  ;;  %v1736_v40 = vmul.f32 %v2004_v42, %v2452_v13  ;;  %v1726_v13 = vadd.f32 %v1710_v45, %v476_v52 }
 0x3c9   : > { %v1737_v54 = vmul.f32 %v2006_v23, %v2443_v38  ;;  %v1738_v34 = vmul.f32 %v2006_v23, %v2446_v55 }
 0x3ca   : > { %1751 = vst [vmem:[%s2888_s29 + $0x40] sm:$0xff] %v1735_v28  ;;  %1752 = vst [vmem:[%s2888_s29 + $0x48] sm:$0xff] %v1736_v40 }
 0x3cb   : > { %v2008_v57 = vpop.eup %2007  ;;  %1753 = vst [vmem:[%s2888_s29 + $0x50] sm:$0xff] %v1737_v54  ;;  %1754 = vst [vmem:[%s2888_s29 + $0x58] sm:$0xff] %v1738_v34 }
 0x3cc   : > { %v2010_v1 = vpop.eup %2009  ;;  %v1739_v38 = vmul.f32 %v2008_v57, %v2465_v9  ;;  %v1740_v55 = vmul.f32 %v2008_v57, %v2468_v26 }
 0x3cd   : > { %v1741_v7 = vmul.f32 %v2010_v1, %v1725_v44  ;;  %v1742_v6 = vmul.f32 %v2010_v1, %v1726_v13 }
 0x3ce   : > { %1755 = vst [vmem:[%s2888_s29 + $0x60] sm:$0xff] %v1739_v38  ;;  %1756 = vst [vmem:[%s2888_s29 + $0x68] sm:$0xff] %v1740_v55 }
 0x3cf   : > { %1757 = vst [vmem:[%s2888_s29 + $0x70] sm:$0xff] %v1741_v7  ;;  %1758 = vst [vmem:[%s2888_s29 + $0x78] sm:$0xff] %v1742_v6 }
 0x3d0   : > { %2064 = shalt.err (!%p2061_p4)
}
 0x3d1   : > { %s2065_s13 = scalar_lea.hbm %s2929_s16, 2048  ;;  %s2069_s12 = scalar_lea.hbm %s2984_s5, 4096 }
 0x3d2   : > { %p2066_p5 = scmp.ne.s32.totalorder %s2929_s16, %s2065_s13  ;;  %p2070_p1 = scmp.lt.u32.totalorder %s2929_s16, %s2984_s5 }
 0x3d3   : > { %p2071_p3 = scmp.lt.u32.totalorder %s2069_s12, %s2065_s13  ;;  %p2073_p11 = scmp.lt.u32.totalorder %s2065_s13, %s2929_s16 }
 0x3d4   : > { %p2067_p7 = pnand %p2066_p5, %p2991_p12 }
 0x3d5   : > { %p2072_p6 = por %p2071_p3, %p2070_p1 }
 0x3d6   : > { %p2068_p9 = pneg %p2067_p7 }
 0x3d7   : > { %p2074_p13 = por %p2073_p11, %p2072_p6 }
 0x3d9   : > { %p2075_p8 = pnand %p2074_p13, %p2068_p9 }
 0x3db   : > { %2078 = shalt.err (!%p2075_p8)
}
 0x3dc   : > { %s2124_s25 = smov 256   ;;  %s2125_s22 = smov 16  }
 0x3dd   : > { %1920 = dma.vmem_to_hbm [thread:$0]  (%p2991_p12), %s2931_s15, 2048, %s2929_s16, %s1760_s8, %s2124_s25, %s2124_s25, %s2125_s22  }
 0x3de PF: > { %s1788_s28 = sand.u32 1, %s2105_s18   ;;  %p2992_p10 = scmp.ne.s32.totalorder %s2989_s6, 0 }
 0x3df   : > { %p2993_p0 = scmp.ge.s32.totalorder %s2117_s21, 2  ;;  %s1789_s7 = scalar_lea.sflag [#allocation4], %s1788_s28 }
 0x3e1   : > { %p1927_p2 = pnand %p2993_p0, %p2992_p10 }
 0x3e3   : > { %2100 = dma.done.wait (!%p1927_p2), %s1789_s7, 2048  }
 0x3e4   : > { %2102 = vsyncadd (!%p1927_p2), %s1789_s7, 4294965248  ;;  %p18_p4 = scmp.ge.s32.totalorder %s2181_s24, 4   ;;  %s2994_s18 = smov %s2109_s19 }
 0x3e5   : > { %s2995_s19 = smov %s2113_s20  ;;  %s2996_s20 = smov %s2193_s27 }
 0x3e6   : > { %s2997_s21 = smov %s2181_s24  ;;  %20 = sbr.rel (!%p18_p4) target bundleno = 5 (0x5), region = 97 }
 0x3ed   :  { %1794 = vsyncpa [#allocation3], 1 }
 0x3ee   :  { %1796 = vsyncpa [#allocation3 + $0x1], 1 }
 0x3ef   :  { %1797 = vsyncpa [#allocation4], 1 }
 0x3f0   :  { %1799 = vsyncpa [#allocation4 + $0x1], 1 }

</bundles_post_ra>
